<compile_context>
chip_gen: v7x
topology: tpu7x:2x2x1
jax: 0.10.0
libtpu: 0.0.40
codegen_flags: <defaults>
</compile_context>

<pallas_src>
import functools

import jax
import jax.numpy as jnp
from jax.experimental import pallas as pl
from jax.experimental.pallas import tpu as pltpu


# ------------------------------------------------------------------ kernel

def _dnn3_fused_kernel(x_ref, w_ref, out_ref, *, V, H):
    """Fused DNN3 forward.

    x_ref  : (B, S, 2) f32; feature 0 carries integer embedding ids,
             feature 1 is the scalar input to fnnf2.
    w_ref  : (V + 4 + H, 4H) f32 packed / pre-folded parameter buffer:
               rows [0, V)        T      = emb_table @ Wih[:E]          (folded)
               row  V             r      = f2_w @ Wih[E:]               (folded)
               row  V+1           b_all  = f2_b @ Wih[E:] + (b_ih+b_hh) (folded)
               rows [V+2, V+2+H)  Whh    = per-gate W_hh, lane-concatenated
               row  V+2+H         w_fold^T = (Wfnn @ Wout)^T  in lanes [0, H)
               row  V+3+H         b_fold   = bfnn @ Wout + bout at lane 0
             gate lane order: [i | f | g | o], each H lanes wide.
    out_ref: (B, S) f32, batch-first scalar output.
    """
    B, S, _ = x_ref.shape
    G = 4 * H

    # ---- hoisted parameter views (static slices of one VMEM buffer) -------
    T = w_ref[0:V, :]                              # (V, 4H)
    r = w_ref[V:V + 1, :]                          # (1, 4H)
    b_all = w_ref[V + 1:V + 2, :]                  # (1, 4H)
    whh = w_ref[V + 2:V + 2 + H, :]                # (H, 4H)
    w_out = w_ref[V + 2 + H:V + 3 + H, 0:H]        # (1, H)  folded fnn@out weight
    b_out = w_ref[V + 3 + H:V + 4 + H, 0:1]        # (1, 1)  folded fnn@out bias

    # ---- prologue: input-side gate pre-activations, ALL timesteps at once --
    x = x_ref[...]                                             # (B, S, 2)
    ids = x[:, :, 0].astype(jnp.int32)                         # (B, S)
    feat = x[:, :, 1].reshape(B * S, 1)                        # (B*S, 1)

    onehot = (ids[:, :, None] ==
              jax.lax.broadcasted_iota(jnp.int32, (B, S, V), 2)
              ).astype(jnp.float32).reshape(B * S, V)          # (B*S, V)

    pre = (jnp.dot(onehot, T, preferred_element_type=jnp.float32)
           + feat * r + b_all)                                 # (B*S, 4H)
    pre = pre.reshape(B, S, G)                                 # batch-major view

    # ---- recurrence: ONE (B,H)@(H,4H) dot per step on the serial path ------
    lane = jax.lax.broadcasted_iota(jnp.int32, (B, S), 1)      # output lane mask
    h = jnp.zeros((B, H), jnp.float32)
    c = jnp.zeros((B, H), jnp.float32)
    y = jnp.zeros((B, S), jnp.float32)
    for t in range(S):                                         # static -> unrolled
        g = pre[:, t, :] + jnp.dot(h, whh, preferred_element_type=jnp.float32)
        sg = jax.nn.sigmoid(g)                                 # full-width EUP
        th = jnp.tanh(g)                                       # full-width EUP
        i_g = sg[:, 0:H]
        f_g = sg[:, H:2 * H]
        g_g = th[:, 2 * H:3 * H]
        o_g = sg[:, 3 * H:4 * H]
        c = f_g * c + i_g * g_g
        h = o_g * jnp.tanh(c)
        # folded (fnn @ out) projection; not on the serial dependency chain
        y_t = jnp.sum(h * w_out, axis=-1, keepdims=True)       # (B, 1)
        y = y + jnp.where(lane == t, y_t, 0.0)                 # place at lane t

    out_ref[...] = y + b_out                                   # one (B,S) store


# ----------------------------------------------------------------- wrapper

_VMEM = pl.BlockSpec(memory_space=pltpu.MemorySpace.VMEM)


def _pack_params(params):
    """Fold + pack all parameters into one lane-dense (V+4+H, 4H) buffer.

    Pure parameter algebra: under jit (params closed over) this constant-folds,
    so the per-call cost is zero.
    """
    emb = params["embed1"]                      # (V, E)
    f2w = params["fnnf2"]["w"]                  # (1, F2)
    f2b = params["fnnf2"]["b"]                  # (1, F2)
    wih = params["rnn"]["wih"]                  # (4, D, H) gate order i,f,g,o
    whh = params["rnn"]["whh"]                  # (4, H, H)
    b = params["rnn"]["b"]                      # (4, 1, H)  (b_ih + b_hh)
    V, E = emb.shape
    _, D, H = wih.shape
    G = 4 * H

    # per-gate blocks -> lane-concatenated [i | f | g | o]
    wih_all = jnp.transpose(wih, (1, 0, 2)).reshape(D, G)      # (D, 4H)
    whh_all = jnp.transpose(whh, (1, 0, 2)).reshape(H, G)      # (H, 4H)
    b_gates = jnp.transpose(b, (1, 0, 2)).reshape(1, G)        # (1, 4H)

    # fold embedding table + fnnf2 into the input-gate weights
    T = emb @ wih_all[:E, :]                                   # (V, 4H)
    r = f2w @ wih_all[E:, :]                                   # (1, 4H)
    b_all = f2b @ wih_all[E:, :] + b_gates                     # (1, 4H)

    # fold fnn + out (no nonlinearity between them in the torch forward)
    w_fold = params["fnn"]["w"] @ params["out"]["w"]           # (H, 1)
    b_fold = params["fnn"]["b"] @ params["out"]["w"] + params["out"]["b"]  # (1,1)
    w_row = jnp.zeros((1, G), jnp.float32).at[0, :H].set(w_fold[:, 0])
    b_row = jnp.zeros((1, G), jnp.float32).at[0, 0].set(b_fold[0, 0])

    packed = jnp.concatenate([T, r, b_all, whh_all, w_row, b_row], axis=0)
    return packed, V, H


def dnn3_forward(params, x):
    """x: (B, S, 2) float32 (feature 0 holds integer ids). Returns ([out], out)."""
    B, S, _ = x.shape
    packed, V, H = _pack_params(params)

    out_bs = pl.pallas_call(
        functools.partial(_dnn3_fused_kernel, V=V, H=H),
        out_shape=jax.ShapeDtypeStruct((B, S), jnp.float32),
        in_specs=[_VMEM, _VMEM],       # 2 operands total: x + packed weights
        out_specs=_VMEM,
    )(x, packed)

    out = out_bs[:, :, None]           # (B, S, 1): trivial reshape, no transpose
    return [out], out


# ------------------------------------------------------------ param builder

def init_dnn3_params(key):
    V, E = 10, 8          # pretrained embedding '0'
    F2 = 8                # fnnf2 output
    D = E + F2            # 16 = hidden_size in the torch ctor (LSTM input)
    H = 2 * D             # 32 = LSTM hidden
    DM = D                # 16 = fnn output
    ks = jax.random.split(key, 10)
    sh = 1.0 / jnp.sqrt(H)
    return {
        "embed1": jax.random.normal(ks[0], (V, E), jnp.float32) * 0.1,
        "fnnf2": dict(
            w=jax.random.uniform(ks[1], (1, F2), jnp.float32, -1.0, 1.0),
            b=jax.random.uniform(ks[2], (1, F2), jnp.float32, -1.0, 1.0)),
        "rnn": dict(
            wih=jax.random.uniform(ks[3], (4, D, H), jnp.float32, -sh, sh),
            whh=jax.random.uniform(ks[4], (4, H, H), jnp.float32, -sh, sh),
            b=jax.random.uniform(ks[5], (4, 1, H), jnp.float32, -sh, sh)),
        "fnn": dict(
            w=jax.random.uniform(ks[6], (H, DM), jnp.float32,
                                 -1.0 / jnp.sqrt(H), 1.0 / jnp.sqrt(H)),
            b=jax.random.uniform(ks[7], (1, DM), jnp.float32,
                                 -1.0 / jnp.sqrt(H), 1.0 / jnp.sqrt(H))),
        "out": dict(
            w=jax.random.uniform(ks[8], (DM, 1), jnp.float32,
                                 -1.0 / jnp.sqrt(DM), 1.0 / jnp.sqrt(DM)),
            b=jax.random.uniform(ks[9], (1, 1), jnp.float32,
                                 -1.0 / jnp.sqrt(DM), 1.0 / jnp.sqrt(DM))),
    }


# ------------------------------------------------------ pure-JAX reference

def _reference_forward(params, x):
    """Unfused reference mirroring the PyTorch DNN3 forward (for validation)."""
    ids = x[:, :, 0].astype(jnp.int32)
    feat = x[:, :, 1][..., None]
    emb = params["embed1"][ids]                                       # (B,S,8)
    f2 = feat * params["fnnf2"]["w"][0] + params["fnnf2"]["b"][0]     # (B,S,8)
    u = jnp.concatenate([emb, f2], axis=-1)                           # (B,S,16)
    B, S, _ = u.shape
    H = params["rnn"]["whh"].shape[2]
    h = jnp.zeros((B, H), jnp.float32)
    c = jnp.zeros((B, H), jnp.float32)
    hs = []
    for t in range(S):
        xt = u[:, t, :]
        g = [xt @ params["rnn"]["wih"][k] + h @ params["rnn"]["whh"][k]
             + params["rnn"]["b"][k] for k in range(4)]
        ig, fg = jax.nn.sigmoid(g[0]), jax.nn.sigmoid(g[1])
        gg, og = jnp.tanh(g[2]), jax.nn.sigmoid(g[3])
        c = fg * c + ig * gg
        h = og * jnp.tanh(c)
        hs.append(h)
    rnn_out = jnp.stack(hs, axis=1)                                   # (B,S,H)
    fnn_out = rnn_out @ params["fnn"]["w"] + params["fnn"]["b"][0]
    return fnn_out @ params["out"]["w"] + params["out"]["b"][0]       # (B,S,1)


# ------------------------------------------------------------------- main

if __name__ == "__main__":
    key = jax.random.PRNGKey(0)
    kp, kid, kx = jax.random.split(key, 3)

    params = init_dnn3_params(kp)

    B, S = 2, 8
    ids = jax.random.randint(kid, (B, S), 0, 10).astype(jnp.float32)
    feat1 = jax.random.normal(kx, (B, S), jnp.float32)
    x = jnp.stack([ids, feat1], axis=-1)                  # (2, 8, 2)

    output_list, out = jax.jit(functools.partial(dnn3_forward, params))(x)
    jax.block_until_ready(out)

    assert out.shape == (B, S, 1)
    assert output_list[0].shape == (B, S, 1)

    ref = _reference_forward(params, x)
    assert jnp.allclose(out, ref, atol=1e-4, rtol=1e-4), "mismatch vs JAX reference"

    print("KERNEL_OK")
</pallas_src>

<mosaic_0001>
module attributes {stable_mosaic.version = 11 : i64} {
  func.func @_dnn3_fused_kernel(%arg0: memref<2x8x2xf32, #tpu.memory_space<vmem>>, %arg1: memref<46x128xf32, #tpu.memory_space<vmem>>, %arg2: memref<2x8xf32, #tpu.memory_space<vmem>>) attributes {dimension_semantics = [], scalar_prefetch = 0 : i64, scratch_operands = 0 : i64, tpu.core_type = #tpu.core_type<tc>} {
    %c0 = arith.constant 0 : index
    %c0_0 = arith.constant 0 : index
    %0 = vector.load %arg1[%c0, %c0_0] : memref<46x128xf32, #tpu.memory_space<vmem>>, vector<10x128xf32>
    %c10 = arith.constant 10 : index
    %c0_1 = arith.constant 0 : index
    %1 = vector.load %arg1[%c10, %c0_1] : memref<46x128xf32, #tpu.memory_space<vmem>>, vector<1x128xf32>
    %c11 = arith.constant 11 : index
    %c0_2 = arith.constant 0 : index
    %2 = vector.load %arg1[%c11, %c0_2] : memref<46x128xf32, #tpu.memory_space<vmem>>, vector<1x128xf32>
    %c12 = arith.constant 12 : index
    %c0_3 = arith.constant 0 : index
    %3 = vector.load %arg1[%c12, %c0_3] : memref<46x128xf32, #tpu.memory_space<vmem>>, vector<32x128xf32>
    %c44 = arith.constant 44 : index
    %c0_4 = arith.constant 0 : index
    %4 = vector.load %arg1[%c44, %c0_4] : memref<46x128xf32, #tpu.memory_space<vmem>>, vector<1x32xf32>
    %c45 = arith.constant 45 : index
    %c0_5 = arith.constant 0 : index
    %5 = vector.load %arg1[%c45, %c0_5] : memref<46x128xf32, #tpu.memory_space<vmem>>, vector<1x1xf32>
    %c0_6 = arith.constant 0 : index
    %c0_7 = arith.constant 0 : index
    %c0_8 = arith.constant 0 : index
    %6 = vector.load %arg0[%c0_6, %c0_7, %c0_8] : memref<2x8x2xf32, #tpu.memory_space<vmem>>, vector<2x8x2xf32>
    %7 = vector.extract_strided_slice %6 {offsets = [0, 0, 0], sizes = [2, 8, 1], strides = [1, 1, 1]} : vector<2x8x2xf32> to vector<2x8x1xf32>
    %8 = vector.shape_cast %7 : vector<2x8x1xf32> to vector<2x8xf32>
    %9 = arith.fptosi %8 : vector<2x8xf32> to vector<2x8xi32>
    %10 = vector.extract_strided_slice %6 {offsets = [0, 0, 1], sizes = [2, 8, 1], strides = [1, 1, 1]} : vector<2x8x2xf32> to vector<2x8x1xf32>
    %11 = vector.shape_cast %10 : vector<2x8x1xf32> to vector<2x8xf32>
    %12 = vector.shape_cast %11 : vector<2x8xf32> to vector<16x1xf32>
    %13 = vector.shape_cast %9 : vector<2x8xi32> to vector<2x8x1xi32>
    %14 = tpu.iota {dimensions = array<i32: 2>} : vector<2x8x10xi32>
    %15 = vector.broadcast %13 : vector<2x8x1xi32> to vector<2x8x10xi32>
    %16 = arith.cmpi eq, %15, %14 : vector<2x8x10xi32>
    %17 = arith.extui %16 : vector<2x8x10xi1> to vector<2x8x10xi32>
    %18 = arith.sitofp %17 : vector<2x8x10xi32> to vector<2x8x10xf32>
    %19 = vector.shape_cast %18 : vector<2x8x10xf32> to vector<16x10xf32>
    %cst = arith.constant dense<0.000000e+00> : vector<16x128xf32>
    %20 = tpu.matmul %19, %0, %cst {dimension_numbers = #tpu.dot_dimension_numbers<[1], [0], [0], [1], [0, 0, 1, 1], [], []>} : vector<16x10xf32>, vector<10x128xf32>, vector<16x128xf32> -> vector<16x128xf32>
    %21 = vector.broadcast %12 : vector<16x1xf32> to vector<16x128xf32>
    %22 = vector.broadcast %1 : vector<1x128xf32> to vector<16x128xf32>
    %23 = arith.mulf %21, %22 : vector<16x128xf32>
    %24 = arith.addf %20, %23 : vector<16x128xf32>
    %25 = vector.broadcast %2 : vector<1x128xf32> to vector<16x128xf32>
    %26 = arith.addf %24, %25 : vector<16x128xf32>
    %27 = vector.shape_cast %26 : vector<16x128xf32> to vector<2x8x128xf32>
    %28 = tpu.iota {dimensions = array<i32: 1>} : vector<2x8xi32>
    %cst_9 = arith.constant 0.000000e+00 : f32
    %29 = vector.broadcast %cst_9 : f32 to vector<2x32xf32>
    %cst_10 = arith.constant 0.000000e+00 : f32
    %30 = vector.broadcast %cst_10 : f32 to vector<2x32xf32>
    %cst_11 = arith.constant 0.000000e+00 : f32
    %31 = vector.broadcast %cst_11 : f32 to vector<2x8xf32>
    %32 = vector.extract_strided_slice %27 {offsets = [0, 0, 0], sizes = [2, 1, 128], strides = [1, 1, 1]} : vector<2x8x128xf32> to vector<2x1x128xf32>
    %33 = vector.shape_cast %32 : vector<2x1x128xf32> to vector<2x128xf32>
    %cst_12 = arith.constant dense<0.000000e+00> : vector<2x128xf32>
    %34 = tpu.matmul %29, %3, %cst_12 {dimension_numbers = #tpu.dot_dimension_numbers<[1], [0], [0], [1], [0, 0, 1, 1], [], []>} : vector<2x32xf32>, vector<32x128xf32>, vector<2x128xf32> -> vector<2x128xf32>
    %35 = arith.addf %33, %34 : vector<2x128xf32>
    %36 = arith.negf %35 : vector<2x128xf32>
    %37 = math.exp %36 : vector<2x128xf32>
    %cst_13 = arith.constant 1.000000e+00 : f32
    %38 = vector.broadcast %cst_13 : f32 to vector<2x128xf32>
    %39 = arith.addf %38, %37 : vector<2x128xf32>
    %40 = arith.divf %38, %39 : vector<2x128xf32>
    %41 = math.tanh %35 : vector<2x128xf32>
    %42 = vector.extract_strided_slice %40 {offsets = [0, 0], sizes = [2, 32], strides = [1, 1]} : vector<2x128xf32> to vector<2x32xf32>
    %43 = vector.extract_strided_slice %40 {offsets = [0, 32], sizes = [2, 32], strides = [1, 1]} : vector<2x128xf32> to vector<2x32xf32>
    %44 = vector.extract_strided_slice %41 {offsets = [0, 64], sizes = [2, 32], strides = [1, 1]} : vector<2x128xf32> to vector<2x32xf32>
    %45 = vector.extract_strided_slice %40 {offsets = [0, 96], sizes = [2, 32], strides = [1, 1]} : vector<2x128xf32> to vector<2x32xf32>
    %46 = arith.mulf %43, %30 : vector<2x32xf32>
    %47 = arith.mulf %42, %44 : vector<2x32xf32>
    %48 = arith.addf %46, %47 : vector<2x32xf32>
    %49 = math.tanh %48 : vector<2x32xf32>
    %50 = arith.mulf %45, %49 : vector<2x32xf32>
    %51 = vector.broadcast %4 : vector<1x32xf32> to vector<2x32xf32>
    %52 = arith.mulf %50, %51 : vector<2x32xf32>
    %cst_14 = arith.constant dense<0.000000e+00> : vector<2xf32>
    %53 = vector.multi_reduction <add>, %52, %cst_14 [1] : vector<2x32xf32> to vector<2xf32>
    %54 = vector.shape_cast %53 : vector<2xf32> to vector<2x1xf32>
    %c0_i32 = arith.constant 0 : i32
    %55 = vector.broadcast %c0_i32 : i32 to vector<2x8xi32>
    %56 = arith.cmpi eq, %28, %55 : vector<2x8xi32>
    %cst_15 = arith.constant 0.000000e+00 : f32
    %57 = vector.shape_cast %54 : vector<2x1xf32> to vector<2x1xf32>
    %58 = vector.broadcast %57 : vector<2x1xf32> to vector<2x8xf32>
    %59 = vector.broadcast %cst_15 : f32 to vector<2x8xf32>
    %60 = arith.select %56, %58, %59 : vector<2x8xi1>, vector<2x8xf32>
    %61 = arith.addf %31, %60 : vector<2x8xf32>
    %62 = vector.extract_strided_slice %27 {offsets = [0, 1, 0], sizes = [2, 1, 128], strides = [1, 1, 1]} : vector<2x8x128xf32> to vector<2x1x128xf32>
    %63 = vector.shape_cast %62 : vector<2x1x128xf32> to vector<2x128xf32>
    %cst_16 = arith.constant dense<0.000000e+00> : vector<2x128xf32>
    %64 = tpu.matmul %50, %3, %cst_16 {dimension_numbers = #tpu.dot_dimension_numbers<[1], [0], [0], [1], [0, 0, 1, 1], [], []>} : vector<2x32xf32>, vector<32x128xf32>, vector<2x128xf32> -> vector<2x128xf32>
    %65 = arith.addf %63, %64 : vector<2x128xf32>
    %66 = arith.negf %65 : vector<2x128xf32>
    %67 = math.exp %66 : vector<2x128xf32>
    %cst_17 = arith.constant 1.000000e+00 : f32
    %68 = vector.broadcast %cst_17 : f32 to vector<2x128xf32>
    %69 = arith.addf %68, %67 : vector<2x128xf32>
    %70 = arith.divf %68, %69 : vector<2x128xf32>
    %71 = math.tanh %65 : vector<2x128xf32>
    %72 = vector.extract_strided_slice %70 {offsets = [0, 0], sizes = [2, 32], strides = [1, 1]} : vector<2x128xf32> to vector<2x32xf32>
    %73 = vector.extract_strided_slice %70 {offsets = [0, 32], sizes = [2, 32], strides = [1, 1]} : vector<2x128xf32> to vector<2x32xf32>
    %74 = vector.extract_strided_slice %71 {offsets = [0, 64], sizes = [2, 32], strides = [1, 1]} : vector<2x128xf32> to vector<2x32xf32>
    %75 = vector.extract_strided_slice %70 {offsets = [0, 96], sizes = [2, 32], strides = [1, 1]} : vector<2x128xf32> to vector<2x32xf32>
    %76 = arith.mulf %73, %48 : vector<2x32xf32>
    %77 = arith.mulf %72, %74 : vector<2x32xf32>
    %78 = arith.addf %76, %77 : vector<2x32xf32>
    %79 = math.tanh %78 : vector<2x32xf32>
    %80 = arith.mulf %75, %79 : vector<2x32xf32>
    %81 = vector.broadcast %4 : vector<1x32xf32> to vector<2x32xf32>
    %82 = arith.mulf %80, %81 : vector<2x32xf32>
    %cst_18 = arith.constant dense<0.000000e+00> : vector<2xf32>
    %83 = vector.multi_reduction <add>, %82, %cst_18 [1] : vector<2x32xf32> to vector<2xf32>
    %84 = vector.shape_cast %83 : vector<2xf32> to vector<2x1xf32>
    %c1_i32 = arith.constant 1 : i32
    %85 = vector.broadcast %c1_i32 : i32 to vector<2x8xi32>
    %86 = arith.cmpi eq, %28, %85 : vector<2x8xi32>
    %cst_19 = arith.constant 0.000000e+00 : f32
    %87 = vector.shape_cast %84 : vector<2x1xf32> to vector<2x1xf32>
    %88 = vector.broadcast %87 : vector<2x1xf32> to vector<2x8xf32>
    %89 = vector.broadcast %cst_19 : f32 to vector<2x8xf32>
    %90 = arith.select %86, %88, %89 : vector<2x8xi1>, vector<2x8xf32>
    %91 = arith.addf %61, %90 : vector<2x8xf32>
    %92 = vector.extract_strided_slice %27 {offsets = [0, 2, 0], sizes = [2, 1, 128], strides = [1, 1, 1]} : vector<2x8x128xf32> to vector<2x1x128xf32>
    %93 = vector.shape_cast %92 : vector<2x1x128xf32> to vector<2x128xf32>
    %cst_20 = arith.constant dense<0.000000e+00> : vector<2x128xf32>
    %94 = tpu.matmul %80, %3, %cst_20 {dimension_numbers = #tpu.dot_dimension_numbers<[1], [0], [0], [1], [0, 0, 1, 1], [], []>} : vector<2x32xf32>, vector<32x128xf32>, vector<2x128xf32> -> vector<2x128xf32>
    %95 = arith.addf %93, %94 : vector<2x128xf32>
    %96 = arith.negf %95 : vector<2x128xf32>
    %97 = math.exp %96 : vector<2x128xf32>
    %cst_21 = arith.constant 1.000000e+00 : f32
    %98 = vector.broadcast %cst_21 : f32 to vector<2x128xf32>
    %99 = arith.addf %98, %97 : vector<2x128xf32>
    %100 = arith.divf %98, %99 : vector<2x128xf32>
    %101 = math.tanh %95 : vector<2x128xf32>
    %102 = vector.extract_strided_slice %100 {offsets = [0, 0], sizes = [2, 32], strides = [1, 1]} : vector<2x128xf32> to vector<2x32xf32>
    %103 = vector.extract_strided_slice %100 {offsets = [0, 32], sizes = [2, 32], strides = [1, 1]} : vector<2x128xf32> to vector<2x32xf32>
    %104 = vector.extract_strided_slice %101 {offsets = [0, 64], sizes = [2, 32], strides = [1, 1]} : vector<2x128xf32> to vector<2x32xf32>
    %105 = vector.extract_strided_slice %100 {offsets = [0, 96], sizes = [2, 32], strides = [1, 1]} : vector<2x128xf32> to vector<2x32xf32>
    %106 = arith.mulf %103, %78 : vector<2x32xf32>
    %107 = arith.mulf %102, %104 : vector<2x32xf32>
    %108 = arith.addf %106, %107 : vector<2x32xf32>
    %109 = math.tanh %108 : vector<2x32xf32>
    %110 = arith.mulf %105, %109 : vector<2x32xf32>
    %111 = vector.broadcast %4 : vector<1x32xf32> to vector<2x32xf32>
    %112 = arith.mulf %110, %111 : vector<2x32xf32>
    %cst_22 = arith.constant dense<0.000000e+00> : vector<2xf32>
    %113 = vector.multi_reduction <add>, %112, %cst_22 [1] : vector<2x32xf32> to vector<2xf32>
    %114 = vector.shape_cast %113 : vector<2xf32> to vector<2x1xf32>
    %c2_i32 = arith.constant 2 : i32
    %115 = vector.broadcast %c2_i32 : i32 to vector<2x8xi32>
    %116 = arith.cmpi eq, %28, %115 : vector<2x8xi32>
    %cst_23 = arith.constant 0.000000e+00 : f32
    %117 = vector.shape_cast %114 : vector<2x1xf32> to vector<2x1xf32>
    %118 = vector.broadcast %117 : vector<2x1xf32> to vector<2x8xf32>
    %119 = vector.broadcast %cst_23 : f32 to vector<2x8xf32>
    %120 = arith.select %116, %118, %119 : vector<2x8xi1>, vector<2x8xf32>
    %121 = arith.addf %91, %120 : vector<2x8xf32>
    %122 = vector.extract_strided_slice %27 {offsets = [0, 3, 0], sizes = [2, 1, 128], strides = [1, 1, 1]} : vector<2x8x128xf32> to vector<2x1x128xf32>
    %123 = vector.shape_cast %122 : vector<2x1x128xf32> to vector<2x128xf32>
    %cst_24 = arith.constant dense<0.000000e+00> : vector<2x128xf32>
    %124 = tpu.matmul %110, %3, %cst_24 {dimension_numbers = #tpu.dot_dimension_numbers<[1], [0], [0], [1], [0, 0, 1, 1], [], []>} : vector<2x32xf32>, vector<32x128xf32>, vector<2x128xf32> -> vector<2x128xf32>
    %125 = arith.addf %123, %124 : vector<2x128xf32>
    %126 = arith.negf %125 : vector<2x128xf32>
    %127 = math.exp %126 : vector<2x128xf32>
    %cst_25 = arith.constant 1.000000e+00 : f32
    %128 = vector.broadcast %cst_25 : f32 to vector<2x128xf32>
    %129 = arith.addf %128, %127 : vector<2x128xf32>
    %130 = arith.divf %128, %129 : vector<2x128xf32>
    %131 = math.tanh %125 : vector<2x128xf32>
    %132 = vector.extract_strided_slice %130 {offsets = [0, 0], sizes = [2, 32], strides = [1, 1]} : vector<2x128xf32> to vector<2x32xf32>
    %133 = vector.extract_strided_slice %130 {offsets = [0, 32], sizes = [2, 32], strides = [1, 1]} : vector<2x128xf32> to vector<2x32xf32>
    %134 = vector.extract_strided_slice %131 {offsets = [0, 64], sizes = [2, 32], strides = [1, 1]} : vector<2x128xf32> to vector<2x32xf32>
    %135 = vector.extract_strided_slice %130 {offsets = [0, 96], sizes = [2, 32], strides = [1, 1]} : vector<2x128xf32> to vector<2x32xf32>
    %136 = arith.mulf %133, %108 : vector<2x32xf32>
    %137 = arith.mulf %132, %134 : vector<2x32xf32>
    %138 = arith.addf %136, %137 : vector<2x32xf32>
    %139 = math.tanh %138 : vector<2x32xf32>
    %140 = arith.mulf %135, %139 : vector<2x32xf32>
    %141 = vector.broadcast %4 : vector<1x32xf32> to vector<2x32xf32>
    %142 = arith.mulf %140, %141 : vector<2x32xf32>
    %cst_26 = arith.constant dense<0.000000e+00> : vector<2xf32>
    %143 = vector.multi_reduction <add>, %142, %cst_26 [1] : vector<2x32xf32> to vector<2xf32>
    %144 = vector.shape_cast %143 : vector<2xf32> to vector<2x1xf32>
    %c3_i32 = arith.constant 3 : i32
    %145 = vector.broadcast %c3_i32 : i32 to vector<2x8xi32>
    %146 = arith.cmpi eq, %28, %145 : vector<2x8xi32>
    %cst_27 = arith.constant 0.000000e+00 : f32
    %147 = vector.shape_cast %144 : vector<2x1xf32> to vector<2x1xf32>
    %148 = vector.broadcast %147 : vector<2x1xf32> to vector<2x8xf32>
    %149 = vector.broadcast %cst_27 : f32 to vector<2x8xf32>
    %150 = arith.select %146, %148, %149 : vector<2x8xi1>, vector<2x8xf32>
    %151 = arith.addf %121, %150 : vector<2x8xf32>
    %152 = vector.extract_strided_slice %27 {offsets = [0, 4, 0], sizes = [2, 1, 128], strides = [1, 1, 1]} : vector<2x8x128xf32> to vector<2x1x128xf32>
    %153 = vector.shape_cast %152 : vector<2x1x128xf32> to vector<2x128xf32>
    %cst_28 = arith.constant dense<0.000000e+00> : vector<2x128xf32>
    %154 = tpu.matmul %140, %3, %cst_28 {dimension_numbers = #tpu.dot_dimension_numbers<[1], [0], [0], [1], [0, 0, 1, 1], [], []>} : vector<2x32xf32>, vector<32x128xf32>, vector<2x128xf32> -> vector<2x128xf32>
    %155 = arith.addf %153, %154 : vector<2x128xf32>
    %156 = arith.negf %155 : vector<2x128xf32>
    %157 = math.exp %156 : vector<2x128xf32>
    %cst_29 = arith.constant 1.000000e+00 : f32
    %158 = vector.broadcast %cst_29 : f32 to vector<2x128xf32>
    %159 = arith.addf %158, %157 : vector<2x128xf32>
    %160 = arith.divf %158, %159 : vector<2x128xf32>
    %161 = math.tanh %155 : vector<2x128xf32>
    %162 = vector.extract_strided_slice %160 {offsets = [0, 0], sizes = [2, 32], strides = [1, 1]} : vector<2x128xf32> to vector<2x32xf32>
    %163 = vector.extract_strided_slice %160 {offsets = [0, 32], sizes = [2, 32], strides = [1, 1]} : vector<2x128xf32> to vector<2x32xf32>
    %164 = vector.extract_strided_slice %161 {offsets = [0, 64], sizes = [2, 32], strides = [1, 1]} : vector<2x128xf32> to vector<2x32xf32>
    %165 = vector.extract_strided_slice %160 {offsets = [0, 96], sizes = [2, 32], strides = [1, 1]} : vector<2x128xf32> to vector<2x32xf32>
    %166 = arith.mulf %163, %138 : vector<2x32xf32>
    %167 = arith.mulf %162, %164 : vector<2x32xf32>
    %168 = arith.addf %166, %167 : vector<2x32xf32>
    %169 = math.tanh %168 : vector<2x32xf32>
    %170 = arith.mulf %165, %169 : vector<2x32xf32>
    %171 = vector.broadcast %4 : vector<1x32xf32> to vector<2x32xf32>
    %172 = arith.mulf %170, %171 : vector<2x32xf32>
    %cst_30 = arith.constant dense<0.000000e+00> : vector<2xf32>
    %173 = vector.multi_reduction <add>, %172, %cst_30 [1] : vector<2x32xf32> to vector<2xf32>
    %174 = vector.shape_cast %173 : vector<2xf32> to vector<2x1xf32>
    %c4_i32 = arith.constant 4 : i32
    %175 = vector.broadcast %c4_i32 : i32 to vector<2x8xi32>
    %176 = arith.cmpi eq, %28, %175 : vector<2x8xi32>
    %cst_31 = arith.constant 0.000000e+00 : f32
    %177 = vector.shape_cast %174 : vector<2x1xf32> to vector<2x1xf32>
    %178 = vector.broadcast %177 : vector<2x1xf32> to vector<2x8xf32>
    %179 = vector.broadcast %cst_31 : f32 to vector<2x8xf32>
    %180 = arith.select %176, %178, %179 : vector<2x8xi1>, vector<2x8xf32>
    %181 = arith.addf %151, %180 : vector<2x8xf32>
    %182 = vector.extract_strided_slice %27 {offsets = [0, 5, 0], sizes = [2, 1, 128], strides = [1, 1, 1]} : vector<2x8x128xf32> to vector<2x1x128xf32>
    %183 = vector.shape_cast %182 : vector<2x1x128xf32> to vector<2x128xf32>
    %cst_32 = arith.constant dense<0.000000e+00> : vector<2x128xf32>
    %184 = tpu.matmul %170, %3, %cst_32 {dimension_numbers = #tpu.dot_dimension_numbers<[1], [0], [0], [1], [0, 0, 1, 1], [], []>} : vector<2x32xf32>, vector<32x128xf32>, vector<2x128xf32> -> vector<2x128xf32>
    %185 = arith.addf %183, %184 : vector<2x128xf32>
    %186 = arith.negf %185 : vector<2x128xf32>
    %187 = math.exp %186 : vector<2x128xf32>
    %cst_33 = arith.constant 1.000000e+00 : f32
    %188 = vector.broadcast %cst_33 : f32 to vector<2x128xf32>
    %189 = arith.addf %188, %187 : vector<2x128xf32>
    %190 = arith.divf %188, %189 : vector<2x128xf32>
    %191 = math.tanh %185 : vector<2x128xf32>
    %192 = vector.extract_strided_slice %190 {offsets = [0, 0], sizes = [2, 32], strides = [1, 1]} : vector<2x128xf32> to vector<2x32xf32>
    %193 = vector.extract_strided_slice %190 {offsets = [0, 32], sizes = [2, 32], strides = [1, 1]} : vector<2x128xf32> to vector<2x32xf32>
    %194 = vector.extract_strided_slice %191 {offsets = [0, 64], sizes = [2, 32], strides = [1, 1]} : vector<2x128xf32> to vector<2x32xf32>
    %195 = vector.extract_strided_slice %190 {offsets = [0, 96], sizes = [2, 32], strides = [1, 1]} : vector<2x128xf32> to vector<2x32xf32>
    %196 = arith.mulf %193, %168 : vector<2x32xf32>
    %197 = arith.mulf %192, %194 : vector<2x32xf32>
    %198 = arith.addf %196, %197 : vector<2x32xf32>
    %199 = math.tanh %198 : vector<2x32xf32>
    %200 = arith.mulf %195, %199 : vector<2x32xf32>
    %201 = vector.broadcast %4 : vector<1x32xf32> to vector<2x32xf32>
    %202 = arith.mulf %200, %201 : vector<2x32xf32>
    %cst_34 = arith.constant dense<0.000000e+00> : vector<2xf32>
    %203 = vector.multi_reduction <add>, %202, %cst_34 [1] : vector<2x32xf32> to vector<2xf32>
    %204 = vector.shape_cast %203 : vector<2xf32> to vector<2x1xf32>
    %c5_i32 = arith.constant 5 : i32
    %205 = vector.broadcast %c5_i32 : i32 to vector<2x8xi32>
    %206 = arith.cmpi eq, %28, %205 : vector<2x8xi32>
    %cst_35 = arith.constant 0.000000e+00 : f32
    %207 = vector.shape_cast %204 : vector<2x1xf32> to vector<2x1xf32>
    %208 = vector.broadcast %207 : vector<2x1xf32> to vector<2x8xf32>
    %209 = vector.broadcast %cst_35 : f32 to vector<2x8xf32>
    %210 = arith.select %206, %208, %209 : vector<2x8xi1>, vector<2x8xf32>
    %211 = arith.addf %181, %210 : vector<2x8xf32>
    %212 = vector.extract_strided_slice %27 {offsets = [0, 6, 0], sizes = [2, 1, 128], strides = [1, 1, 1]} : vector<2x8x128xf32> to vector<2x1x128xf32>
    %213 = vector.shape_cast %212 : vector<2x1x128xf32> to vector<2x128xf32>
    %cst_36 = arith.constant dense<0.000000e+00> : vector<2x128xf32>
    %214 = tpu.matmul %200, %3, %cst_36 {dimension_numbers = #tpu.dot_dimension_numbers<[1], [0], [0], [1], [0, 0, 1, 1], [], []>} : vector<2x32xf32>, vector<32x128xf32>, vector<2x128xf32> -> vector<2x128xf32>
    %215 = arith.addf %213, %214 : vector<2x128xf32>
    %216 = arith.negf %215 : vector<2x128xf32>
    %217 = math.exp %216 : vector<2x128xf32>
    %cst_37 = arith.constant 1.000000e+00 : f32
    %218 = vector.broadcast %cst_37 : f32 to vector<2x128xf32>
    %219 = arith.addf %218, %217 : vector<2x128xf32>
    %220 = arith.divf %218, %219 : vector<2x128xf32>
    %221 = math.tanh %215 : vector<2x128xf32>
    %222 = vector.extract_strided_slice %220 {offsets = [0, 0], sizes = [2, 32], strides = [1, 1]} : vector<2x128xf32> to vector<2x32xf32>
    %223 = vector.extract_strided_slice %220 {offsets = [0, 32], sizes = [2, 32], strides = [1, 1]} : vector<2x128xf32> to vector<2x32xf32>
    %224 = vector.extract_strided_slice %221 {offsets = [0, 64], sizes = [2, 32], strides = [1, 1]} : vector<2x128xf32> to vector<2x32xf32>
    %225 = vector.extract_strided_slice %220 {offsets = [0, 96], sizes = [2, 32], strides = [1, 1]} : vector<2x128xf32> to vector<2x32xf32>
    %226 = arith.mulf %223, %198 : vector<2x32xf32>
    %227 = arith.mulf %222, %224 : vector<2x32xf32>
    %228 = arith.addf %226, %227 : vector<2x32xf32>
    %229 = math.tanh %228 : vector<2x32xf32>
    %230 = arith.mulf %225, %229 : vector<2x32xf32>
    %231 = vector.broadcast %4 : vector<1x32xf32> to vector<2x32xf32>
    %232 = arith.mulf %230, %231 : vector<2x32xf32>
    %cst_38 = arith.constant dense<0.000000e+00> : vector<2xf32>
    %233 = vector.multi_reduction <add>, %232, %cst_38 [1] : vector<2x32xf32> to vector<2xf32>
    %234 = vector.shape_cast %233 : vector<2xf32> to vector<2x1xf32>
    %c6_i32 = arith.constant 6 : i32
    %235 = vector.broadcast %c6_i32 : i32 to vector<2x8xi32>
    %236 = arith.cmpi eq, %28, %235 : vector<2x8xi32>
    %cst_39 = arith.constant 0.000000e+00 : f32
    %237 = vector.shape_cast %234 : vector<2x1xf32> to vector<2x1xf32>
    %238 = vector.broadcast %237 : vector<2x1xf32> to vector<2x8xf32>
    %239 = vector.broadcast %cst_39 : f32 to vector<2x8xf32>
    %240 = arith.select %236, %238, %239 : vector<2x8xi1>, vector<2x8xf32>
    %241 = arith.addf %211, %240 : vector<2x8xf32>
    %242 = vector.extract_strided_slice %27 {offsets = [0, 7, 0], sizes = [2, 1, 128], strides = [1, 1, 1]} : vector<2x8x128xf32> to vector<2x1x128xf32>
    %243 = vector.shape_cast %242 : vector<2x1x128xf32> to vector<2x128xf32>
    %cst_40 = arith.constant dense<0.000000e+00> : vector<2x128xf32>
    %244 = tpu.matmul %230, %3, %cst_40 {dimension_numbers = #tpu.dot_dimension_numbers<[1], [0], [0], [1], [0, 0, 1, 1], [], []>} : vector<2x32xf32>, vector<32x128xf32>, vector<2x128xf32> -> vector<2x128xf32>
    %245 = arith.addf %243, %244 : vector<2x128xf32>
    %246 = arith.negf %245 : vector<2x128xf32>
    %247 = math.exp %246 : vector<2x128xf32>
    %cst_41 = arith.constant 1.000000e+00 : f32
    %248 = vector.broadcast %cst_41 : f32 to vector<2x128xf32>
    %249 = arith.addf %248, %247 : vector<2x128xf32>
    %250 = arith.divf %248, %249 : vector<2x128xf32>
    %251 = math.tanh %245 : vector<2x128xf32>
    %252 = vector.extract_strided_slice %250 {offsets = [0, 0], sizes = [2, 32], strides = [1, 1]} : vector<2x128xf32> to vector<2x32xf32>
    %253 = vector.extract_strided_slice %250 {offsets = [0, 32], sizes = [2, 32], strides = [1, 1]} : vector<2x128xf32> to vector<2x32xf32>
    %254 = vector.extract_strided_slice %251 {offsets = [0, 64], sizes = [2, 32], strides = [1, 1]} : vector<2x128xf32> to vector<2x32xf32>
    %255 = vector.extract_strided_slice %250 {offsets = [0, 96], sizes = [2, 32], strides = [1, 1]} : vector<2x128xf32> to vector<2x32xf32>
    %256 = arith.mulf %253, %228 : vector<2x32xf32>
    %257 = arith.mulf %252, %254 : vector<2x32xf32>
    %258 = arith.addf %256, %257 : vector<2x32xf32>
    %259 = math.tanh %258 : vector<2x32xf32>
    %260 = arith.mulf %255, %259 : vector<2x32xf32>
    %261 = vector.broadcast %4 : vector<1x32xf32> to vector<2x32xf32>
    %262 = arith.mulf %260, %261 : vector<2x32xf32>
    %cst_42 = arith.constant dense<0.000000e+00> : vector<2xf32>
    %263 = vector.multi_reduction <add>, %262, %cst_42 [1] : vector<2x32xf32> to vector<2xf32>
    %264 = vector.shape_cast %263 : vector<2xf32> to vector<2x1xf32>
    %c7_i32 = arith.constant 7 : i32
    %265 = vector.broadcast %c7_i32 : i32 to vector<2x8xi32>
    %266 = arith.cmpi eq, %28, %265 : vector<2x8xi32>
    %cst_43 = arith.constant 0.000000e+00 : f32
    %267 = vector.shape_cast %264 : vector<2x1xf32> to vector<2x1xf32>
    %268 = vector.broadcast %267 : vector<2x1xf32> to vector<2x8xf32>
    %269 = vector.broadcast %cst_43 : f32 to vector<2x8xf32>
    %270 = arith.select %266, %268, %269 : vector<2x8xi1>, vector<2x8xf32>
    %271 = arith.addf %241, %270 : vector<2x8xf32>
    %272 = vector.broadcast %5 : vector<1x1xf32> to vector<2x8xf32>
    %273 = arith.addf %271, %272 : vector<2x8xf32>
    %c0_44 = arith.constant 0 : index
    %c0_45 = arith.constant 0 : index
    %274 = vector.load %arg2[%c0_44, %c0_45] : memref<2x8xf32, #tpu.memory_space<vmem>>, vector<2x8xf32>
    tpu.vector_store %arg2[%c0_44, %c0_45], %273 {strides = array<i32>} : memref<2x8xf32, #tpu.memory_space<vmem>>, vector<2x8xf32>,
    return
  }
}

</mosaic_0001>

<bundles_post_ra>
// kernel: dnn3_forward.1
= control target key start
LH: loop header
LB: loop body
LE: loop exit
PB: predicated region body
PF: predicated region fallthrough
CT: control target
= control target key end

     0   :  { %v1808_v0 = vmov 0   ;;  %v1809_v3 = vmov 0.0|0.0   ;;  %vm62_vm0 = vcmask 1041408   ;;  %vm1810_vm1 = vmmov 1   ;;  %s1814_s28 = smov 64   ;;  %s1815_s29 = smov 32   ;;  %s2121_s0 = inlined_call_operand.vmem [shape: f32[2,8,2], index: 0, kind: input, shape index: {}]   ;;  %s2122_s1 = inlined_call_operand.vmem [shape: f32[46,128], index: 1, kind: input, shape index: {}]   ;;  %s2123_s2 = inlined_call_operand.vmem [shape: f32[2,8], index: 2, kind: output, shape index: {}]  }
   0x1   :  { %1677 = vset.pattern.permute.xlu0 %v1808_v0  ;;  %v21_v1 = vld [vmem:[%s2121_s0] sm:$0xff]  ;;  %v22_v2 = vld [vmem:[%s2121_s0 + $0x8] sm:$0xff]  ;;  %1614 = vmatprep.subr.bf16.mxu1 %v1809_v3  ;;  %v16_v7 = vld [vmem:[%s2122_s1 + $0x14] sm:$0xff]  ;;  %vm1811_vm3 = vmmov 0   ;;  %v1812_v17 = vmov 0.0   ;;  %v1813_v18 = vmov 1   ;;  %v25_v19 = vlaneseq }
   0x2   :  { %v1662_v4 = vtrunc.f32 %v21_v1  ;;  %v1664_v5 = vtrunc.f32 %v22_v2  ;;  %v15_v6 = vld [vmem:[%s2122_s1 + $0xc] sm:$0xff]  ;;  %v11_v10 = vld [vmem:[%s2122_s1] sm:$0xff]  ;;  %v12_v11 = vld [vmem:[%s2122_s1 + $0x8] sm:$0x3]  ;;  %1528 = vmatprep.mubr.msk.f32.mxu1 %vm1811_vm3, %v1812_v17  ;;  %1678 = vset.pattern.permute.xlu1 %v1813_v18  ;;  %vm55_vm4 = vcmask 80896   ;;  %vm288_vm7 = vcmask 1041409  }
   0x3   :  { %v1845_v9 = vpack.c.bf16 %v16_v7, %v15_v6  ;;  %v1608_v13 = vpack.c.bf16 %v12_v11, %v11_v10  ;;  %vm1609_vm2 = vmpackc.low %vm62_vm0, %vm1810_vm1  ;;  %v17_v14 = vld [vmem:[%s2122_s1 + $0x1c] sm:$0xff]  ;;  %v18_v15 = vld [vmem:[%s2122_s1 + $0x24] sm:$0xff]  ;;  %46 = vperm.xlu1 %1678, %v22_v2   ;;  %v1875_v20 = vand.u32 127, %v25_v19  ;;  %vm147_vm8 = vcmask 261120   ;;  %s1816_s4 = smov 96  }
   0x4   :  { %v1663_v8 = vcvt.f32.s32 %v1662_v4  ;;  %v1665_v12 = vcvt.f32.s32 %v1664_v5  ;;  %v1861_v16 = vpack.c.bf16 %v18_v15, %v17_v14  ;;  %v1440_v28 = vld [vmem:[%s2122_s1 + $0xa] ss:$0 sm:$0xff]  ;;  %v1444_v32 = vld [vmem:[%s2122_s1 + $0xb] ss:$0 sm:$0xff]  ;;  %vm443_vm9 = vcmask 1042434  }
   0x5   :  { %1616 = vmatpush3.bf16.msra.mxu1 %v1845_v9  ;;  %1610 = vmatprep.subr.msk.bf16.mxu0 %vm1609_vm2, %v1608_v13  ;;  %vm293_vm10 = vcmask 254976   ;;  %vm448_vm11 = vcmask 256001   ;;  %vm602_vm12 = vcmask 1043459   ;;  %vm922_vm13 = vcmask 1045509  }
   0x6   :  { %28 = vperm.xlu0 %1677, %v1663_v8   ;;  %1617 = vmatprep.subr.bf16.mxu1 %v1809_v3  ;;  %vm1082_vm14 = vcmask 1046534   ;;  %vm1242_vm15 = vcmask 1047559   ;;  %vm607_vm0 = vcmask 257026   ;;  %vm927_vm1 = vcmask 259076  }
   0x7   :  { %1613 = vmatpush3.bf16.msk.msra.mxu0 %vm1609_vm2, %v1608_v13  ;;  %41 = vperm.xlu1 %1678, %v21_v1   ;;  %vm1408_vm2 = vcmask 261127  }
   0x8   :  { %1620 = vmatprep.subr.bf16.mxu0 %v1809_v3 }
   0x9   :  { %1619 = vmatpush3.bf16.msra.mxu1 %v1861_v16 }
   0xa   :  { %31 = vperm.xlu0 %1677, %v1665_v12   ;;  %1626 = vmatprep.subr.bf16.mxu1 %v1809_v3 }
   0xc   :  { %1529 = vmatmul.mubr.f32.vlgmr.msra.gmra.mrb[0].mxu1 %v1812_v17 }
   0xd   :  { %1628 = vmatpush3.bf16.msra.mxu1 %v1845_v9  ;;  %1550 = vmatprep.mubr.msk.f32.mxu1 %vm1811_vm3, %v1812_v17 }
   0xe   :  { %1629 = vmatprep.subr.bf16.mxu1 %v1809_v3  ;;  %1679 = vset.pattern.permute.xlu0 %v1813_v18 }
  0x11   :  { %1631 = vmatpush3.bf16.msra.mxu1 %v1861_v16 }
  0x12   :  { %1638 = vmatprep.subr.bf16.mxu1 %v1809_v3 }
  0x82   :  { %v47_v27 = vpop.permute.xlu1 %46 }
  0x83   :  { %v54_v30 = vmul.f32 %v1440_v28, %v47_v27 }
  0x85   :  { %v29_v21 = vpop.permute.xlu0 %28 }
  0x86   :  { %vm33_vm5 = vcmp.eq.s32.totalorder %v29_v21, %v1875_v20  ;;  %v42_v29 = vpop.permute.xlu1 %41 }
  0x87   :  { %v1438_v22 = vsel %vm33_vm5, 1.0, %v1812_v17  ;;  %v53_v31 = vmul.f32 %v1440_v28, %v42_v29  ;;  %vm297_vm5 = vcmp.eq.s32.totalorder %v1875_v20, 0 }
  0x88   :  { %1517 = vmatprep.mubr.msk.f32.mxu0 %vm55_vm4, %v1438_v22 }
  0x89   :  { %v32_v23 = vpop.permute.xlu0 %31 }
  0x8a   :  { %vm34_vm6 = vcmp.eq.s32.totalorder %v32_v23, %v1875_v20 }
  0x8b   :  { %v1439_v24 = vsel %vm34_vm6, 1.0, %v1812_v17  ;;  %vm611_vm6 = vcmp.eq.s32.totalorder %v1875_v20, 2 }
  0x8c   :  { %1518 = vmatmul.mubr.msk.f32.vlgmr.msra.gmra.mrb[0].mxu0 %vm55_vm4, %v1439_v24  ;;  %vm452_vm4 = vcmp.eq.s32.totalorder %v1875_v20, 1 }
  0x8d   :  { %1622 = vmatpush3.bf16.msra.mxu0 %v1845_v9  ;;  %1539 = vmatprep.mubr.msk.f32.mxu0 %vm1811_vm3, %v1812_v17 }
  0x8e   :  { %1623 = vmatprep.subr.bf16.mxu0 %v1809_v3 }
  0x91   :  { %1625 = vmatpush3.bf16.msra.mxu0 %v1861_v16 }
  0x92   :  { %1632 = vmatprep.subr.bf16.mxu0 %v1809_v3 }
  0xdf   :  { %v217_v25 = vpop.f32.mrb[0].mxu1 }
  0xe0   :  { %v1530_v26 = vpop.f32.mrb[1].mxu1  ;;  %v222_v36 = vrot.slane %v217_v25, 1 }
 0x15f   :  { %v1519_v33 = vpop.f32.mrb[0].mxu0 }
 0x160   :  { %v138_v34 = vadd.f32 %v1519_v33, %v54_v30  ;;  %v132_v35 = vpop.f32.mrb[1].mxu0 }
 0x161   :  { %v133_v37 = vadd.f32 %v132_v35, %v53_v31 }
 0x162   :  { %v1893_v38 = vadd.f32 %v1444_v32, %v138_v34 }
 0x163   :  { %v1895_v39 = vadd.f32 %v1444_v32, %v133_v37 }
 0x164   :  { %v226_v40 = vadd.f32 %v222_v36, %v1893_v38 }
 0x165   :  { %v225_v41 = vadd.f32 %v217_v25, %v1895_v39 }
 0x166   :  { %1680 = vtanh.f32 %v226_v40  ;;  %v1446_v44 = vmul.f32 -1.442695, %v226_v40 }
 0x167   :  { %1682 = vtanh.f32 %v225_v41  ;;  %v1445_v45 = vmul.f32 -1.442695, %v225_v41 }
 0x168   :  { %1684 = vpow2.f32 %v1446_v44 }
 0x169   :  { %1686 = vpow2.f32 %v1445_v45 }
 0x170   :  { %v1681_v42 = vpop.eup %1680 }
 0x171   :  { %v1683_v43 = vpop.eup %1682  ;;  %247 = vrot.lane.b32.xlu0 %v1681_v42, %s1814_s28 }
 0x172   :  { %245 = vrot.lane.b32.xlu1 %v1683_v43, %s1814_s28  ;;  %v1685_v46 = vpop.eup %1684 }
 0x173   :  { %v1687_v47 = vpop.eup %1686  ;;  %v234_v48 = vadd.f32 1.0, %v1685_v46 }
 0x174   :  { %v233_v49 = vadd.f32 1.0, %v1687_v47 }
 0x175   :  { %1688 = vrcp.f32 %v234_v48 }
 0x176   :  { %1690 = vrcp.f32 %v233_v49 }
 0x17f   :  { %v1689_v50 = vpop.eup %1688 }
 0x180   :  { %v1691_v52 = vpop.eup %1690  ;;  %v242_v56 = vmul.f32 0.0, %v1689_v50 }
 0x181   :  { %v241_v58 = vmul.f32 0.0, %v1691_v52 }
 0x1e3   :  { %v248_v51 = vpop.permute.xlu0 %247 }
 0x1e4   :  { %v252_v53 = vmul.f32 %v1689_v50, %v248_v51  ;;  %v246_v54 = vpop.permute.xlu1 %245 }
 0x1e5   :  { %v251_v55 = vmul.f32 %v1691_v52, %v246_v54 }
 0x1e6   :  { %257 = vrot.lane.b32.xlu0 %v252_v53, %s1815_s29 }
 0x1e7   :  { %255 = vrot.lane.b32.xlu1 %v251_v55, %s1815_s29 }
 0x258   :  { %v258_v57 = vpop.permute.xlu0 %257 }
 0x259   :  { %v262_v59 = vadd.f32 %v258_v57, %v242_v56  ;;  %v256_v60 = vpop.permute.xlu1 %255 }
 0x25a   :  { %v261_v61 = vadd.f32 %v256_v60, %v241_v58 }
 0x25b   :  { %1692 = vtanh.f32 %v262_v59  ;;  %v401_v31 = vrot.slane %v262_v59, 7 }
 0x25c   :  { %1694 = vtanh.f32 %v261_v61  ;;  %v400_v33 = vrot.slane %v261_v61, 7 }
 0x265   :  { %v1693_v62 = vpop.eup %1692 }
 0x266   :  { %v1695_v63 = vpop.eup %1694  ;;  %269 = vrot.lane.b32.xlu0 %v1693_v62, %s1814_s28 }
 0x267   :  { %267 = vrot.lane.b32.xlu1 %v1695_v63, %s1814_s28 }
 0x2d8   :  { %v270_v0 = vpop.permute.xlu0 %269 }
 0x2d9   :  { %v1905_v1 = vmul.f32 %v1689_v50, %v270_v0  ;;  %v268_v2 = vpop.permute.xlu1 %267 }
 0x2da   :  { %v1907_v4 = vmul.f32 %v1691_v52, %v268_v2 }
 0x2db   :  { %v302_v5 = vrot.slane %v1905_v1, 7 }
 0x2dd   :  { %v303_v6 = vsel %vm288_vm7, %v302_v5, %v1907_v4 }
 0x2de   :  { %304 = vrot.lane.b32.xlu0 %v303_v6, %s1815_s29 }
 0x350   :  { %v305_v7 = vpop.permute.xlu0 %304 }
 0x351   :  { %1540 = vmatmul.mubr.msk.f32.vlgmr.msra.gmra.mrb[2].mxu0 %vm147_vm8, %v305_v7 }
 0x352   :  { %1634 = vmatpush3.bf16.msra.mxu0 %v1845_v9  ;;  %1561 = vmatprep.mubr.msk.f32.mxu0 %vm1811_vm3, %v1812_v17 }
 0x353   :  { %1635 = vmatprep.subr.bf16.mxu0 %v1809_v3 }
 0x356   :  { %1637 = vmatpush3.bf16.msra.mxu0 %v1861_v16 }
 0x357   :  { %1644 = vmatprep.subr.bf16.mxu0 %v1809_v3 }
 0x424   :  { %v374_v8 = vpop.f32.mrb[2].mxu0 }
 0x425   :  { %v379_v10 = vrot.slane %v374_v8, 7  ;;  %v383_v11 = vadd.f32 %v374_v8, %v1893_v38  ;;  %v1541_v12 = vpop.f32.mrb[3].mxu0 }
 0x427   :  { %v382_v13 = vadd.f32 %v379_v10, %v1895_v39  ;;  %1696 = vtanh.f32 %v383_v11  ;;  %v1450_v18 = vmul.f32 -1.442695, %v383_v11 }
 0x429   :  { %1698 = vtanh.f32 %v382_v13  ;;  %v1449_v19 = vmul.f32 -1.442695, %v382_v13 }
 0x42a   :  { %1700 = vpow2.f32 %v1450_v18 }
 0x42b   :  { %1702 = vpow2.f32 %v1449_v19 }
 0x431   :  { %v1697_v14 = vpop.eup %1696 }
 0x432   :  { %410 = vrot.lane.b32.xlu0 %v1697_v14, %s1814_s28 }
 0x433   :  { %v1699_v15 = vpop.eup %1698 }
 0x434   :  { %408 = vrot.lane.b32.xlu1 %v1699_v15, %s1814_s28  ;;  %v1701_v21 = vpop.eup %1700 }
 0x435   :  { %v1703_v22 = vpop.eup %1702  ;;  %v391_v23 = vadd.f32 1.0, %v1701_v21 }
 0x436   :  { %v390_v24 = vadd.f32 1.0, %v1703_v22 }
 0x437   :  { %1704 = vrcp.f32 %v391_v23 }
 0x438   :  { %1706 = vrcp.f32 %v390_v24 }
 0x441   :  { %v1705_v25 = vpop.eup %1704 }
 0x442   :  { %v1707_v28 = vpop.eup %1706  ;;  %v405_v32 = vmul.f32 %v1705_v25, %v401_v31 }
 0x443   :  { %v404_v36 = vmul.f32 %v1707_v28, %v400_v33 }
 0x4a4   :  { %v411_v26 = vpop.permute.xlu0 %410 }
 0x4a5   :  { %v415_v27 = vmul.f32 %v1705_v25, %v411_v26 }
 0x4a6   :  { %v409_v29 = vpop.permute.xlu1 %408 }
 0x4a7   :  { %420 = vrot.lane.b32.xlu0 %v415_v27, %s1815_s29  ;;  %v414_v30 = vmul.f32 %v1707_v28, %v409_v29 }
 0x4a9   :  { %418 = vrot.lane.b32.xlu1 %v414_v30, %s1815_s29 }
 0x519   :  { %v421_v34 = vpop.permute.xlu0 %420 }
 0x51a   :  { %v425_v35 = vadd.f32 %v421_v34, %v405_v32 }
 0x51b   :  { %v419_v37 = vpop.permute.xlu1 %418 }
 0x51c   :  { %1708 = vtanh.f32 %v425_v35  ;;  %v424_v40 = vadd.f32 %v419_v37, %v404_v36  ;;  %v560_v11 = vrot.slane %v425_v35, 7 }
 0x51e   :  { %1710 = vtanh.f32 %v424_v40  ;;  %v559_v10 = vrot.slane %v424_v40, 7 }
 0x526   :  { %v1709_v41 = vpop.eup %1708 }
 0x527   :  { %432 = vrot.lane.b32.xlu0 %v1709_v41, %s1814_s28 }
 0x528   :  { %v1711_v42 = vpop.eup %1710 }
 0x529   :  { %430 = vrot.lane.b32.xlu1 %v1711_v42, %s1814_s28 }
 0x599   :  { %v433_v43 = vpop.permute.xlu0 %432 }
 0x59a   :  { %v1930_v46 = vmul.f32 %v1705_v25, %v433_v43 }
 0x59b   :  { %v431_v44 = vpop.permute.xlu1 %430 }
 0x59c   :  { %v1928_v45 = vmul.f32 %v1707_v28, %v431_v44 }
 0x59e   :  { %v460_v47 = vrot.slane %v1928_v45, 1 }
 0x5a0   :  { %v461_v48 = vsel %vm288_vm7, %v1930_v46, %v460_v47 }
 0x5a1   :  { %462 = vrot.lane.b32.xlu1 %v461_v48, %s1815_s29 }
 0x613   :  { %v463_v49 = vpop.permute.xlu1 %462 }
 0x614   :  { %1551 = vmatmul.mubr.msk.f32.vlgmr.msra.gmra.mrb[2].mxu1 %vm147_vm8, %v463_v49 }
 0x615   :  { %1640 = vmatpush3.bf16.msra.mxu1 %v1845_v9  ;;  %1572 = vmatprep.mubr.msk.f32.mxu1 %vm1811_vm3, %v1812_v17 }
 0x616   :  { %1641 = vmatprep.subr.bf16.mxu1 %v1809_v3 }
 0x619   :  { %1643 = vmatpush3.bf16.msra.mxu1 %v1861_v16 }
 0x61a   :  { %1650 = vmatprep.subr.bf16.mxu1 %v1809_v3 }
 0x6e7   :  { %v532_v50 = vpop.f32.mrb[2].mxu1 }
 0x6e8   :  { %v537_v51 = vrot.slane %v532_v50, 6  ;;  %v538_v52 = vrot.slane %v532_v50, 7  ;;  %v1552_v53 = vpop.f32.mrb[3].mxu1 }
 0x6ea   :  { %v541_v54 = vadd.f32 %v537_v51, %v1895_v39  ;;  %v542_v55 = vadd.f32 %v538_v52, %v1893_v38 }
 0x6ec   :  { %1712 = vtanh.f32 %v541_v54  ;;  %v1452_v58 = vmul.f32 -1.442695, %v541_v54  ;;  %v1453_v59 = vmul.f32 -1.442695, %v542_v55 }
 0x6ed   :  { %1714 = vtanh.f32 %v542_v55 }
 0x6ee   :  { %1716 = vpow2.f32 %v1452_v58 }
 0x6ef   :  { %1718 = vpow2.f32 %v1453_v59 }
 0x6f6   :  { %v1713_v56 = vpop.eup %1712 }
 0x6f7   :  { %v1715_v57 = vpop.eup %1714  ;;  %567 = vrot.lane.b32.xlu0 %v1713_v56, %s1814_s28 }
 0x6f8   :  { %569 = vrot.lane.b32.xlu1 %v1715_v57, %s1814_s28  ;;  %v1717_v60 = vpop.eup %1716 }
 0x6f9   :  { %v1719_v61 = vpop.eup %1718  ;;  %v549_v62 = vadd.f32 1.0, %v1717_v60 }
 0x6fa   :  { %v550_v63 = vadd.f32 1.0, %v1719_v61 }
 0x6fb   :  { %1720 = vrcp.f32 %v549_v62 }
 0x6fc   :  { %1722 = vrcp.f32 %v550_v63 }
 0x705   :  { %v1721_v0 = vpop.eup %1720 }
 0x706   :  { %v1723_v5 = vpop.eup %1722  ;;  %v563_v12 = vmul.f32 %v1721_v0, %v559_v10 }
 0x707   :  { %v564_v13 = vmul.f32 %v1723_v5, %v560_v11 }
 0x769   :  { %v568_v2 = vpop.permute.xlu0 %567 }
 0x76a   :  { %v570_v6 = vpop.permute.xlu1 %569  ;;  %v573_v7 = vmul.f32 %v1721_v0, %v568_v2 }
 0x76b   :  { %v574_v8 = vmul.f32 %v1723_v5, %v570_v6 }
 0x76c   :  { %577 = vrot.lane.b32.xlu0 %v573_v7, %s1815_s29 }
 0x76d   :  { %579 = vrot.lane.b32.xlu1 %v574_v8, %s1815_s29 }
 0x7de   :  { %v578_v14 = vpop.permute.xlu0 %577 }
 0x7df   :  { %v580_v15 = vpop.permute.xlu1 %579  ;;  %v583_v18 = vadd.f32 %v578_v14, %v563_v12 }
 0x7e0   :  { %v584_v19 = vadd.f32 %v580_v15, %v564_v13 }
 0x7e1   :  { %1724 = vtanh.f32 %v583_v18  ;;  %v719_v55 = vrot.slane %v583_v18, 7 }
 0x7e2   :  { %1726 = vtanh.f32 %v584_v19  ;;  %v720_v56 = vrot.slane %v584_v19, 7 }
 0x7eb   :  { %v1725_v21 = vpop.eup %1724 }
 0x7ec   :  { %v1727_v22 = vpop.eup %1726  ;;  %589 = vrot.lane.b32.xlu0 %v1725_v21, %s1814_s28 }
 0x7ed   :  { %591 = vrot.lane.b32.xlu1 %v1727_v22, %s1814_s28 }
 0x85e   :  { %v590_v23 = vpop.permute.xlu0 %589 }
 0x85f   :  { %v592_v24 = vpop.permute.xlu1 %591  ;;  %v1951_v25 = vmul.f32 %v1721_v0, %v590_v23 }
 0x860   :  { %v1953_v26 = vmul.f32 %v1723_v5, %v592_v24 }
 0x861   :  { %v619_v27 = vrot.slane %v1951_v25, 2 }
 0x862   :  { %v620_v28 = vrot.slane %v1953_v26, 1 }
 0x864   :  { %v621_v29 = vsel %vm288_vm7, %v620_v28, %v619_v27 }
 0x865   :  { %622 = vrot.lane.b32.xlu0 %v621_v29, %s1815_s29 }
 0x8d7   :  { %v623_v30 = vpop.permute.xlu0 %622 }
 0x8d8   :  { %1562 = vmatmul.mubr.msk.f32.vlgmr.msra.gmra.mrb[4].mxu0 %vm147_vm8, %v623_v30 }
 0x8d9   :  { %1646 = vmatpush3.bf16.msra.mxu0 %v1845_v9  ;;  %1583 = vmatprep.mubr.msk.f32.mxu0 %vm1811_vm3, %v1812_v17 }
 0x8da   :  { %1647 = vmatprep.subr.bf16.mxu0 %v1809_v3 }
 0x8dd   :  { %1649 = vmatpush3.bf16.msra.mxu0 %v1861_v16 }
 0x8de   :  { %1656 = vmatprep.subr.bf16.mxu0 %v1809_v3 }
 0x9ab   :  { %v692_v31 = vpop.f32.mrb[4].mxu0 }
 0x9ac   :  { %v697_v32 = vrot.slane %v692_v31, 5  ;;  %v698_v33 = vrot.slane %v692_v31, 6  ;;  %v1563_v34 = vpop.f32.mrb[5].mxu0 }
 0x9ae   :  { %v701_v35 = vadd.f32 %v697_v32, %v1895_v39  ;;  %v702_v36 = vadd.f32 %v698_v33, %v1893_v38 }
 0x9b0   :  { %1728 = vtanh.f32 %v701_v35  ;;  %v1455_v41 = vmul.f32 -1.442695, %v701_v35  ;;  %v1456_v42 = vmul.f32 -1.442695, %v702_v36 }
 0x9b1   :  { %1730 = vtanh.f32 %v702_v36 }
 0x9b2   :  { %1732 = vpow2.f32 %v1455_v41 }
 0x9b3   :  { %1734 = vpow2.f32 %v1456_v42 }
 0x9ba   :  { %v1729_v37 = vpop.eup %1728 }
 0x9bb   :  { %v1731_v40 = vpop.eup %1730  ;;  %727 = vrot.lane.b32.xlu1 %v1729_v37, %s1814_s28 }
 0x9bc   :  { %729 = vrot.lane.b32.xlu0 %v1731_v40, %s1814_s28  ;;  %v1733_v43 = vpop.eup %1732 }
 0x9bd   :  { %v1735_v44 = vpop.eup %1734  ;;  %v709_v47 = vadd.f32 1.0, %v1733_v43 }
 0x9be   :  { %v710_v48 = vadd.f32 1.0, %v1735_v44 }
 0x9bf   :  { %1736 = vrcp.f32 %v709_v47 }
 0x9c0   :  { %1738 = vrcp.f32 %v710_v48 }
 0x9c9   :  { %v1737_v49 = vpop.eup %1736 }
 0x9ca   :  { %v1739_v51 = vpop.eup %1738  ;;  %v723_v57 = vmul.f32 %v1737_v49, %v719_v55 }
 0x9cb   :  { %v724_v58 = vmul.f32 %v1739_v51, %v720_v56 }
 0xa2d   :  { %v728_v50 = vpop.permute.xlu1 %727 }
 0xa2e   :  { %v730_v52 = vpop.permute.xlu0 %729  ;;  %v733_v53 = vmul.f32 %v1737_v49, %v728_v50 }
 0xa2f   :  { %v734_v54 = vmul.f32 %v1739_v51, %v730_v52 }
 0xa30   :  { %737 = vrot.lane.b32.xlu1 %v733_v53, %s1815_s29 }
 0xa31   :  { %739 = vrot.lane.b32.xlu0 %v734_v54, %s1815_s29 }
 0xaa2   :  { %v738_v59 = vpop.permute.xlu1 %737 }
 0xaa3   :  { %v740_v60 = vpop.permute.xlu0 %739  ;;  %v743_v61 = vadd.f32 %v738_v59, %v723_v57 }
 0xaa4   :  { %v744_v62 = vadd.f32 %v740_v60, %v724_v58 }
 0xaa5   :  { %1740 = vtanh.f32 %v743_v61  ;;  %v879_v40 = vrot.slane %v743_v61, 7 }
 0xaa6   :  { %1742 = vtanh.f32 %v744_v62  ;;  %v880_v41 = vrot.slane %v744_v62, 7 }
 0xaaf   :  { %v1741_v63 = vpop.eup %1740 }
 0xab0   :  { %v1743_v0 = vpop.eup %1742  ;;  %749 = vrot.lane.b32.xlu1 %v1741_v63, %s1814_s28 }
 0xab1   :  { %751 = vrot.lane.b32.xlu0 %v1743_v0, %s1814_s28 }
 0xb22   :  { %v750_v2 = vpop.permute.xlu1 %749 }
 0xb23   :  { %v752_v5 = vpop.permute.xlu0 %751  ;;  %v1974_v6 = vmul.f32 %v1737_v49, %v750_v2 }
 0xb24   :  { %v1976_v7 = vmul.f32 %v1739_v51, %v752_v5 }
 0xb25   :  { %v779_v8 = vrot.slane %v1974_v6, 3 }
 0xb26   :  { %v780_v10 = vrot.slane %v1976_v7, 2 }
 0xb28   :  { %v781_v11 = vsel %vm288_vm7, %v780_v10, %v779_v8 }
 0xb29   :  { %782 = vrot.lane.b32.xlu1 %v781_v11, %s1815_s29 }
 0xb9b   :  { %v783_v12 = vpop.permute.xlu1 %782 }
 0xb9c   :  { %1573 = vmatmul.mubr.msk.f32.vlgmr.msra.gmra.mrb[4].mxu1 %vm147_vm8, %v783_v12 }
 0xb9d   :  { %1652 = vmatpush3.bf16.msra.mxu1 %v1845_v9  ;;  %1594 = vmatprep.mubr.msk.f32.mxu1 %vm1811_vm3, %v1812_v17 }
 0xb9e   :  { %1653 = vmatprep.subr.bf16.mxu1 %v1809_v3 }
 0xba1   :  { %1655 = vmatpush3.bf16.msra.mxu1 %v1861_v16 }
 0xc6f   :  { %v852_v13 = vpop.f32.mrb[4].mxu1 }
 0xc70   :  { %v857_v14 = vrot.slane %v852_v13, 4  ;;  %v858_v15 = vrot.slane %v852_v13, 5  ;;  %v1574_v18 = vpop.f32.mrb[5].mxu1 }
 0xc72   :  { %v861_v19 = vadd.f32 %v857_v14, %v1895_v39  ;;  %v862_v21 = vadd.f32 %v858_v15, %v1893_v38 }
 0xc74   :  { %1744 = vtanh.f32 %v861_v19  ;;  %v1458_v24 = vmul.f32 -1.442695, %v861_v19  ;;  %v1459_v27 = vmul.f32 -1.442695, %v862_v21 }
 0xc75   :  { %1746 = vtanh.f32 %v862_v21 }
 0xc76   :  { %1748 = vpow2.f32 %v1458_v24 }
 0xc77   :  { %1750 = vpow2.f32 %v1459_v27 }
 0xc7e   :  { %v1745_v22 = vpop.eup %1744 }
 0xc7f   :  { %v1747_v23 = vpop.eup %1746  ;;  %887 = vrot.lane.b32.xlu0 %v1745_v22, %s1814_s28 }
 0xc80   :  { %889 = vrot.lane.b32.xlu1 %v1747_v23, %s1814_s28  ;;  %v1749_v28 = vpop.eup %1748 }
 0xc81   :  { %v1751_v29 = vpop.eup %1750  ;;  %v869_v30 = vadd.f32 1.0, %v1749_v28 }
 0xc82   :  { %v870_v31 = vadd.f32 1.0, %v1751_v29 }
 0xc83   :  { %1752 = vrcp.f32 %v869_v30 }
 0xc84   :  { %1754 = vrcp.f32 %v870_v31 }
 0xc8d   :  { %v1753_v32 = vpop.eup %1752 }
 0xc8e   :  { %v1755_v34 = vpop.eup %1754  ;;  %v883_v42 = vmul.f32 %v1753_v32, %v879_v40 }
 0xc8f   :  { %v884_v43 = vmul.f32 %v1755_v34, %v880_v41 }
 0xcf1   :  { %v888_v33 = vpop.permute.xlu0 %887 }
 0xcf2   :  { %v890_v35 = vpop.permute.xlu1 %889  ;;  %v893_v36 = vmul.f32 %v1753_v32, %v888_v33 }
 0xcf3   :  { %v894_v37 = vmul.f32 %v1755_v34, %v890_v35 }
 0xcf4   :  { %897 = vrot.lane.b32.xlu0 %v893_v36, %s1815_s29 }
 0xcf5   :  { %899 = vrot.lane.b32.xlu1 %v894_v37, %s1815_s29 }
 0xd66   :  { %v898_v44 = vpop.permute.xlu0 %897 }
 0xd67   :  { %v900_v47 = vpop.permute.xlu1 %899  ;;  %v903_v48 = vadd.f32 %v898_v44, %v883_v42 }
 0xd68   :  { %v904_v49 = vadd.f32 %v900_v47, %v884_v43 }
 0xd69   :  { %1756 = vtanh.f32 %v903_v48  ;;  %v1039_v21 = vrot.slane %v903_v48, 7 }
 0xd6a   :  { %1758 = vtanh.f32 %v904_v49  ;;  %v1040_v22 = vrot.slane %v904_v49, 7 }
 0xd73   :  { %v1757_v50 = vpop.eup %1756 }
 0xd74   :  { %v1759_v51 = vpop.eup %1758  ;;  %909 = vrot.lane.b32.xlu0 %v1757_v50, %s1814_s28 }
 0xd75   :  { %911 = vrot.lane.b32.xlu1 %v1759_v51, %s1814_s28 }
 0xde6   :  { %v910_v52 = vpop.permute.xlu0 %909 }
 0xde7   :  { %v912_v53 = vpop.permute.xlu1 %911  ;;  %v1996_v54 = vmul.f32 %v1753_v32, %v910_v52 }
 0xde8   :  { %v1998_v55 = vmul.f32 %v1755_v34, %v912_v53 }
 0xde9   :  { %v939_v56 = vrot.slane %v1996_v54, 4 }
 0xdea   :  { %v940_v57 = vrot.slane %v1998_v55, 3 }
 0xdec   :  { %v941_v58 = vsel %vm288_vm7, %v940_v57, %v939_v56 }
 0xded   :  { %942 = vrot.lane.b32.xlu0 %v941_v58, %s1815_s29 }
 0xe5f   :  { %v943_v59 = vpop.permute.xlu0 %942 }
 0xe60   :  { %1584 = vmatmul.mubr.msk.f32.vlgmr.msra.gmra.mrb[6].mxu0 %vm147_vm8, %v943_v59 }
 0xe61   :  { %1658 = vmatpush3.bf16.msra.mxu0 %v1845_v9  ;;  %1605 = vmatprep.mubr.msk.f32.mxu0 %vm1811_vm3, %v1812_v17  ;;  %vm762_vm3 = vcmask 1044484  }
 0xe62   :  { %1659 = vmatprep.subr.bf16.mxu0 %v1809_v3 }
 0xe65   :  { %1661 = vmatpush3.bf16.msra.mxu0 %v1861_v16 }
 0xf33   :  { %v1012_v60 = vpop.f32.mrb[6].mxu0 }
 0xf34   :  { %v1017_v61 = vrot.slane %v1012_v60, 3  ;;  %v1018_v62 = vrot.slane %v1012_v60, 4  ;;  %v1585_v63 = vpop.f32.mrb[7].mxu0 }
 0xf36   :  { %v1021_v0 = vadd.f32 %v1017_v61, %v1895_v39  ;;  %v1022_v2 = vadd.f32 %v1018_v62, %v1893_v38 }
 0xf38   :  { %1760 = vtanh.f32 %v1021_v0  ;;  %v1461_v9 = vmul.f32 -1.442695, %v1021_v0  ;;  %v1462_v3 = vmul.f32 -1.442695, %v1022_v2 }
 0xf39   :  { %1762 = vtanh.f32 %v1022_v2 }
 0xf3a   :  { %1764 = vpow2.f32 %v1461_v9 }
 0xf3b   :  { %1766 = vpow2.f32 %v1462_v3 }
 0xf42   :  { %v1761_v5 = vpop.eup %1760 }
 0xf43   :  { %v1763_v8 = vpop.eup %1762  ;;  %1047 = vrot.lane.b32.xlu1 %v1761_v5, %s1814_s28 }
 0xf44   :  { %1049 = vrot.lane.b32.xlu0 %v1763_v8, %s1814_s28  ;;  %v1765_v16 = vpop.eup %1764 }
 0xf45   :  { %v1767_v17 = vpop.eup %1766  ;;  %v1029_v10 = vadd.f32 1.0, %v1765_v16 }
 0xf46   :  { %v1030_v11 = vadd.f32 1.0, %v1767_v17 }
 0xf47   :  { %1768 = vrcp.f32 %v1029_v10 }
 0xf48   :  { %1770 = vrcp.f32 %v1030_v11 }
 0xf51   :  { %v1769_v12 = vpop.eup %1768 }
 0xf52   :  { %v1771_v14 = vpop.eup %1770  ;;  %v1043_v23 = vmul.f32 %v1769_v12, %v1039_v21 }
 0xf53   :  { %v1044_v24 = vmul.f32 %v1771_v14, %v1040_v22 }
 0xfb5   :  { %v1048_v13 = vpop.permute.xlu1 %1047 }
 0xfb6   :  { %v1050_v15 = vpop.permute.xlu0 %1049  ;;  %v1053_v18 = vmul.f32 %v1769_v12, %v1048_v13 }
 0xfb7   :  { %v1054_v19 = vmul.f32 %v1771_v14, %v1050_v15 }
 0xfb8   :  { %1057 = vrot.lane.b32.xlu1 %v1053_v18, %s1815_s29 }
 0xfb9   :  { %1059 = vrot.lane.b32.xlu0 %v1054_v19, %s1815_s29 }
0x102a   :  { %v1058_v27 = vpop.permute.xlu1 %1057 }
0x102b   :  { %v1060_v28 = vpop.permute.xlu0 %1059  ;;  %v1063_v29 = vadd.f32 %v1058_v27, %v1043_v23 }
0x102c   :  { %v1064_v30 = vadd.f32 %v1060_v28, %v1044_v24 }
0x102d   :  { %1772 = vtanh.f32 %v1063_v29  ;;  %v1199_v8 = vrot.slane %v1063_v29, 7 }
0x102e   :  { %1774 = vtanh.f32 %v1064_v30  ;;  %v1200_v9 = vrot.slane %v1064_v30, 7 }
0x1037   :  { %v1773_v31 = vpop.eup %1772 }
0x1038   :  { %v1775_v32 = vpop.eup %1774  ;;  %1069 = vrot.lane.b32.xlu1 %v1773_v31, %s1814_s28 }
0x1039   :  { %1071 = vrot.lane.b32.xlu0 %v1775_v32, %s1814_s28 }
0x10aa   :  { %v1070_v33 = vpop.permute.xlu1 %1069 }
0x10ab   :  { %v1072_v34 = vpop.permute.xlu0 %1071  ;;  %v2018_v35 = vmul.f32 %v1769_v12, %v1070_v33 }
0x10ac   :  { %v2020_v36 = vmul.f32 %v1771_v14, %v1072_v34 }
0x10ad   :  { %v1099_v37 = vrot.slane %v2018_v35, 5 }
0x10ae   :  { %v1100_v40 = vrot.slane %v2020_v36, 4 }
0x10b0   :  { %v1101_v41 = vsel %vm288_vm7, %v1100_v40, %v1099_v37 }
0x10b1   :  { %1102 = vrot.lane.b32.xlu1 %v1101_v41, %s1815_s29 }
0x1123   :  { %v1103_v42 = vpop.permute.xlu1 %1102 }
0x1124   :  { %1595 = vmatmul.mubr.msk.f32.vlgmr.msra.gmra.mrb[6].mxu1 %vm147_vm8, %v1103_v42 }
0x11f7   :  { %v1172_v43 = vpop.f32.mrb[6].mxu1 }
0x11f8   :  { %v1177_v44 = vrot.slane %v1172_v43, 2  ;;  %v1178_v47 = vrot.slane %v1172_v43, 3  ;;  %v1596_v48 = vpop.f32.mrb[7].mxu1 }
0x11fa   :  { %v1181_v49 = vadd.f32 %v1177_v44, %v1895_v39  ;;  %v1182_v50 = vadd.f32 %v1178_v47, %v1893_v38 }
0x11fc   :  { %1776 = vtanh.f32 %v1181_v49  ;;  %v1464_v53 = vmul.f32 -1.442695, %v1181_v49  ;;  %v1465_v56 = vmul.f32 -1.442695, %v1182_v50 }
0x11fd   :  { %1778 = vtanh.f32 %v1182_v50 }
0x11fe   :  { %1780 = vpow2.f32 %v1464_v53 }
0x11ff   :  { %1782 = vpow2.f32 %v1465_v56 }
0x1206   :  { %v1777_v51 = vpop.eup %1776 }
0x1207   :  { %v1779_v52 = vpop.eup %1778  ;;  %1207 = vrot.lane.b32.xlu0 %v1777_v51, %s1814_s28 }
0x1208   :  { %1209 = vrot.lane.b32.xlu1 %v1779_v52, %s1814_s28  ;;  %v1781_v57 = vpop.eup %1780  ;;  %v1447_v52 = vld [vmem:[%s2122_s1 + $0x2c] ss:$0 sm:$0xff] }
0x1209   :  { %v1783_v58 = vpop.eup %1782  ;;  %v1189_v59 = vadd.f32 1.0, %v1781_v57 }
0x120a   :  { %v1190_v60 = vadd.f32 1.0, %v1783_v58 }
0x120b   :  { %1784 = vrcp.f32 %v1189_v59 }
0x120c   :  { %1786 = vrcp.f32 %v1190_v60 }
0x1215   :  { %v1785_v61 = vpop.eup %1784 }
0x1216   :  { %v1787_v63 = vpop.eup %1786  ;;  %v1203_v3 = vmul.f32 %v1785_v61, %v1199_v8 }
0x1217   :  { %v1204_v16 = vmul.f32 %v1787_v63, %v1200_v9 }
0x1279   :  { %v1208_v62 = vpop.permute.xlu0 %1207 }
0x127a   :  { %v1210_v0 = vpop.permute.xlu1 %1209  ;;  %v1213_v2 = vmul.f32 %v1785_v61, %v1208_v62 }
0x127b   :  { %v1214_v5 = vmul.f32 %v1787_v63, %v1210_v0 }
0x127c   :  { %1217 = vrot.lane.b32.xlu0 %v1213_v2, %s1815_s29 }
0x127d   :  { %1219 = vrot.lane.b32.xlu1 %v1214_v5, %s1815_s29 }
0x12ee   :  { %v1218_v17 = vpop.permute.xlu0 %1217 }
0x12ef   :  { %v1220_v10 = vpop.permute.xlu1 %1219  ;;  %v1223_v11 = vadd.f32 %v1218_v17, %v1203_v3 }
0x12f0   :  { %v1224_v12 = vadd.f32 %v1220_v10, %v1204_v16 }
0x12f1   :  { %1788 = vtanh.f32 %v1223_v11  ;;  %v1359_v58 = vrot.slane %v1223_v11, 7 }
0x12f2   :  { %1790 = vtanh.f32 %v1224_v12  ;;  %v1360_v53 = vrot.slane %v1224_v12, 7 }
0x12fb   :  { %v1789_v13 = vpop.eup %1788 }
0x12fc   :  { %v1791_v14 = vpop.eup %1790  ;;  %1229 = vrot.lane.b32.xlu0 %v1789_v13, %s1814_s28 }
0x12fd   :  { %1231 = vrot.lane.b32.xlu1 %v1791_v14, %s1814_s28 }
0x136e   :  { %v1230_v15 = vpop.permute.xlu0 %1229 }
0x136f   :  { %v1232_v18 = vpop.permute.xlu1 %1231  ;;  %v2035_v19 = vmul.f32 %v1785_v61, %v1230_v15 }
0x1370   :  { %v2037_v21 = vmul.f32 %v1787_v63, %v1232_v18 }
0x1371   :  { %v1259_v22 = vrot.slane %v2035_v19, 6 }
0x1372   :  { %v1260_v23 = vrot.slane %v2037_v21, 5 }
0x1374   :  { %v1261_v24 = vsel %vm288_vm7, %v1260_v23, %v1259_v22 }
0x1375   :  { %1262 = vrot.lane.b32.xlu0 %v1261_v24, %s1815_s29 }
0x13e7   :  { %v1263_v27 = vpop.permute.xlu0 %1262 }
0x13e8   :  { %1606 = vmatmul.mubr.msk.f32.vlgmr.msra.gmra.mrb[8].mxu0 %vm147_vm8, %v1263_v27  ;;  %vm1087_vm8 = vcmask 260101  }
0x14bb   :  { %v1332_v28 = vpop.f32.mrb[8].mxu0 }
0x14bc   :  { %v1337_v29 = vrot.slane %v1332_v28, 1  ;;  %v1338_v30 = vrot.slane %v1332_v28, 2  ;;  %v1607_v31 = vpop.f32.mrb[9].mxu0 }
0x14be   :  { %v1341_v32 = vadd.f32 %v1337_v29, %v1895_v39  ;;  %v1342_v33 = vadd.f32 %v1338_v30, %v1893_v38 }
0x14c0   :  { %1792 = vtanh.f32 %v1341_v32  ;;  %v1467_v40 = vmul.f32 -1.442695, %v1341_v32  ;;  %v1468_v41 = vmul.f32 -1.442695, %v1342_v33 }
0x14c1   :  { %1794 = vtanh.f32 %v1342_v33 }
0x14c2   :  { %1796 = vpow2.f32 %v1467_v40 }
0x14c3   :  { %1798 = vpow2.f32 %v1468_v41 }
0x14ca   :  { %v1793_v34 = vpop.eup %1792 }
0x14cb   :  { %v1795_v37 = vpop.eup %1794  ;;  %1367 = vrot.lane.b32.xlu0 %v1793_v34, %s1814_s28 }
0x14cc   :  { %1369 = vrot.lane.b32.xlu1 %v1795_v37, %s1814_s28  ;;  %v1797_v42 = vpop.eup %1796 }
0x14cd   :  { %v1799_v43 = vpop.eup %1798  ;;  %v1349_v44 = vadd.f32 1.0, %v1797_v42 }
0x14ce   :  { %v1350_v47 = vadd.f32 1.0, %v1799_v43 }
0x14cf   :  { %1800 = vrcp.f32 %v1349_v44 }
0x14d0   :  { %1802 = vrcp.f32 %v1350_v47 }
0x14d9   :  { %v2048_v39 = vpop.eup %1800 }
0x14da   :  { %v2050_v48 = vpop.eup %1802  ;;  %v1363_v62 = vmul.f32 %v2048_v39, %v1359_v58 }
0x14db   :  { %v1364_v57 = vmul.f32 %v2050_v48, %v1360_v53 }
0x153d   :  { %v1368_v38 = vpop.permute.xlu0 %1367 }
0x153e   :  { %v1370_v49 = vpop.permute.xlu1 %1369  ;;  %v1373_v50 = vmul.f32 %v2048_v39, %v1368_v38 }
0x153f   :  { %v1374_v51 = vmul.f32 %v2050_v48, %v1370_v49 }
0x1540   :  { %1377 = vrot.lane.b32.xlu0 %v1373_v50, %s1815_s29 }
0x1541   :  { %1379 = vrot.lane.b32.xlu1 %v1374_v51, %s1815_s29  ;;  %v20_v51 = vld [vmem:[%s2122_s1 + $0x2d] sm:$0x1] }
0x1542   :  { %1666 = vpush %v20_v51 }
0x1545   :  { %280 = vrot.lane.b32.xlu1 %v1447_v52, %s1816_s4 }
0x1573   :  { %s1667_s1 = spop %1666 }
0x15b2   :  { %v1378_v60 = vpop.permute.xlu0 %1377 }
0x15b3   :  { %v1380_v56 = vpop.permute.xlu1 %1379  ;;  %v1383_v2 = vadd.f32 %v1378_v60, %v1363_v62 }
0x15b4   :  { %v1384_v59 = vadd.f32 %v1380_v56, %v1364_v57 }
0x15b6   :  { %1804 = vtanh.f32 %v1384_v59 }
0x15b7   :  { %v2060_v61 = vpop.permute.xlu1 %280  ;;  %1806 = vtanh.f32 %v1383_v2 }
0x15b8   :  { %v284_v63 = vmul.f32 %v2060_v61, %v1905_v1  ;;  %v439_v0 = vmul.f32 %v1930_v46, %v2060_v61  ;;  %v283_v5 = vmul.f32 %v2060_v61, %v1907_v4  ;;  %v438_v16 = vmul.f32 %v1928_v45, %v2060_v61 }
0x15b9   :  { %v598_v45 = vmul.f32 %v1953_v26, %v2060_v61  ;;  %v918_v14 = vmul.f32 %v1998_v55, %v2060_v61  ;;  %v597_v15 = vmul.f32 %v1951_v25, %v2060_v61  ;;  %v1078_v23 = vmul.f32 %v2020_v36, %v2060_v61 }
0x15ba   :  { %v287_v8 = vrot.slane %v284_v63, 7  ;;  %v442_v3 = vrot.slane %v439_v0, 7  ;;  %v917_v26 = vmul.f32 %v1996_v54, %v2060_v61  ;;  %v1238_v55 = vmul.f32 %v2037_v21, %v2060_v61 }
0x15bb   :  { %v601_v13 = vrot.slane %v598_v45, 7  ;;  %v921_v22 = vrot.slane %v918_v14, 7  ;;  %v1081_v28 = vrot.slane %v1078_v23, 7  ;;  %v1077_v25 = vmul.f32 %v2018_v35, %v2060_v61 }
0x15bc   :  { %v289_v9 = vsel %vm288_vm7, %v287_v8, %v283_v5  ;;  %v444_v1 = vsel %vm443_vm9, %v442_v3, %v438_v16  ;;  %v1241_v30 = vrot.slane %v1238_v55, 7  ;;  %v1237_v54 = vmul.f32 %v2035_v19, %v2060_v61 }
0x15bd   :  { %290 = vrot.lane.b32.xlu0 %v289_v9, %s1815_s29  ;;  %v603_v18 = vsel %vm602_vm12, %v601_v13, %v597_v15  ;;  %v923_v27 = vsel %vm922_vm13, %v921_v22, %v917_v26  ;;  %v1083_v36 = vsel %vm1082_vm14, %v1081_v28, %v1077_v25  ;;  %v758_v47 = vmul.f32 %v1976_v7, %v2060_v61 }
0x15be   :  { %v1243_v21 = vsel %vm1242_vm15, %v1241_v30, %v1237_v54  ;;  %v757_v49 = vmul.f32 %v1974_v6, %v2060_v61  ;;  %vm767_vm7 = vcmask 258051   ;;  %vm1247_vm9 = vcmask 261126  }
0x15bf   :  { %vm931_vm12 = vcmp.eq.s32.totalorder %v1875_v20, 4  ;;  %vm1091_vm13 = vcmp.eq.s32.totalorder %v1875_v20, 5  ;;  %vm1251_vm14 = vcmp.eq.s32.totalorder %v1875_v20, 6  ;;  %vm1416_vm15 = vcmp.eq.s32.totalorder %v1875_v20, 7 }
0x15c0   :  { %v1805_v46 = vpop.eup %1804  ;;  %v1429_v25 = vstv %s1667_s1 }
0x15c1   :  { %445 = vrot.lane.b32.xlu0 %v444_v1, %s1815_s29  ;;  %v1807_v17 = vpop.eup %1806 }
0x15c5   :  { %1391 = vrot.lane.b32.xlu0 %v1805_v46, %s1814_s28 }
0x15c9   :  { %1389 = vrot.lane.b32.xlu0 %v1807_v17, %s1814_s28 }
0x162f   :  { %v291_v4 = vpop.permute.xlu0 %290 }
0x1630   :  { %v294_v10 = vsel %vm293_vm10, %v291_v4, 0.0  ;;  %vm1412_vm10 = vcmask 253952  }
0x1631   :  { %295 = vadd.xlane.f32.xlu1 %v294_v10 }
0x1633   :  { %v446_v11 = vpop.permute.xlu0 %445 }
0x1634   :  { %v449_v12 = vsel %vm448_vm11, %v446_v11, 0.0  ;;  %vm771_vm11 = vcmp.eq.s32.totalorder %v1875_v20, 3 }
0x1635   :  { %450 = vadd.xlane.f32.xlu0 %v449_v12 }
0x1637   :  { %v1392_v24 = vpop.permute.xlu0 %1391 }
0x1638   :  { %v1396_v31 = vmul.f32 %v2050_v48, %v1392_v24  ;;  %v761_v48 = vrot.slane %v758_v47, 7 }
0x163a   :  { %v1398_v33 = vmul.f32 %v1396_v31, %v2060_v61  ;;  %v763_v50 = vsel %vm762_vm3, %v761_v48, %v757_v49 }
0x163b   :  { %v1390_v29 = vpop.permute.xlu0 %1389 }
0x163c   :  { %v1395_v32 = vmul.f32 %v2048_v39, %v1390_v29  ;;  %v1401_v34 = vrot.slane %v1398_v33, 7 }
0x163e   :  { %v1397_v35 = vmul.f32 %v1395_v32, %v2060_v61 }
0x1642   :  { %604 = vrot.lane.b32.xlu1 %v603_v18, %s1815_s29 }
0x1646   :  { %924 = vrot.lane.b32.xlu1 %v923_v27, %s1815_s29 }
0x164a   :  { %1084 = vrot.lane.b32.xlu1 %v1083_v36, %s1815_s29 }
0x164e   :  { %1244 = vrot.lane.b32.xlu1 %v1243_v21, %s1815_s29 }
0x1652   :  { %1402 = vrot.lane.b32.xlu1 %v1397_v35, %s1815_s29 }
0x1656   :  { %1404 = vrot.lane.b32.xlu1 %v1401_v34, %s1815_s29 }
0x16be   :  { %v296_v37 = vpop.xlane.xlu1 %295 }
0x16bf   :  { %v298_v57 = vsel %vm297_vm5, %v296_v37, 0.0 }
0x16c2   :  { %v605_v40 = vpop.permute.xlu1 %604  ;;  %v451_v52 = vpop.xlane.xlu0 %450 }
0x16c3   :  { %v608_v19 = vsel %vm607_vm0, %v605_v40, 0.0  ;;  %v453_v7 = vsel %vm452_vm4, %v451_v52, 0.0  ;;  %vm1421_vm0 = vcmask 1040384  }
0x16c4   :  { %609 = vadd.xlane.f32.xlu0 %v608_v19  ;;  %v455_v53 = vrot.slane %v453_v7, 1 }
0x16c6   :  { %v925_v41 = vpop.permute.xlu1 %924  ;;  %v457_v58 = vadd.f32 %v455_v53, %v298_v57 }
0x16c7   :  { %v928_v42 = vsel %vm927_vm1, %v925_v41, 0.0  ;;  %vm1432_vm1 = vcmask 58368  }
0x16c8   :  { %929 = vadd.xlane.f32.xlu1 %v928_v42 }
0x16ca   :  { %v1085_v43 = vpop.permute.xlu1 %1084 }
0x16cb   :  { %v1088_v63 = vsel %vm1087_vm8, %v1085_v43, 0.0 }
0x16ce   :  { %v1245_v44 = vpop.permute.xlu1 %1244 }
0x16cf   :  { %v1248_v0 = vsel %vm1247_vm9, %v1245_v44, 0.0 }
0x16d2   :  { %v1403_v39 = vpop.permute.xlu1 %1402 }
0x16d3   :  { %v1409_v38 = vsel %vm1408_vm2, %v1403_v39, 0.0 }
0x16d4   :  { %1410 = vadd.xlane.f32.xlu1 %v1409_v38 }
0x16d6   :  { %v1405_v2 = vpop.permute.xlu1 %1404 }
0x16d7   :  { %v1413_v5 = vsel %vm1412_vm10, %v1405_v2, 0.0 }
0x16da   :  { %764 = vrot.lane.b32.xlu0 %v763_v50, %s1815_s29 }
0x1751   :  { %v610_v56 = vpop.xlane.xlu0 %609 }
0x1752   :  { %v612_v6 = vsel %vm611_vm6, %v610_v56, 0.0 }
0x1753   :  { %v614_v59 = vrot.slane %v612_v6, 2 }
0x1755   :  { %v616_v60 = vadd.f32 %v614_v59, %v457_v58  ;;  %v765_v61 = vpop.permute.xlu0 %764  ;;  %v930_v9 = vpop.xlane.xlu1 %929 }
0x1756   :  { %v768_v62 = vsel %vm767_vm7, %v765_v61, 0.0  ;;  %v932_v1 = vsel %vm931_vm12, %v930_v9, 0.0 }
0x1757   :  { %769 = vadd.xlane.f32.xlu0 %v768_v62  ;;  %v934_v10 = vrot.slane %v932_v1, 4 }
0x175b   :  { %1089 = vadd.xlane.f32.xlu0 %v1088_v63 }
0x175f   :  { %1249 = vadd.xlane.f32.xlu0 %v1248_v0 }
0x1761   :  { %v1411_v11 = vpop.xlane.xlu1 %1410 }
0x1762   :  { %v1417_v15 = vsel %vm1416_vm15, %v1411_v11, 0.0 }
0x1763   :  { %1414 = vadd.xlane.f32.xlu0 %v1413_v5  ;;  %v1422_v26 = vrot.slane %v1417_v15, 7 }
0x17e4   :  { %v770_v8 = vpop.xlane.xlu0 %769 }
0x17e5   :  { %v772_v3 = vsel %vm771_vm11, %v770_v8, 0.0 }
0x17e6   :  { %v774_v16 = vrot.slane %v772_v3, 3 }
0x17e8   :  { %v1090_v46 = vpop.xlane.xlu0 %1089  ;;  %v776_v17 = vadd.f32 %v774_v16, %v616_v60 }
0x17e9   :  { %v1092_v4 = vsel %vm1091_vm13, %v1090_v46, 0.0 }
0x17ea   :  { %v936_v45 = vadd.f32 %v934_v10, %v776_v17  ;;  %v1094_v13 = vrot.slane %v1092_v4, 5 }
0x17ec   :  { %v1250_v12 = vpop.xlane.xlu0 %1249  ;;  %v1096_v23 = vadd.f32 %v1094_v13, %v936_v45 }
0x17ed   :  { %v1252_v14 = vsel %vm1251_vm14, %v1250_v12, 0.0 }
0x17ee   :  { %v1254_v18 = vrot.slane %v1252_v14, 6 }
0x17f0   :  { %v1415_v22 = vpop.xlane.xlu0 %1414  ;;  %v1256_v28 = vadd.f32 %v1254_v18, %v1096_v23 }
0x17f1   :  { %v1418_v24 = vsel %vm1416_vm15, %v1415_v22, 0.0 }
0x17f2   :  { %v1423_v27 = vrot.slane %v1418_v24, 7 }
0x17f4   :  { %v1424_v55 = vsel %vm1421_vm0, %v1422_v26, %v1423_v27 }
0x17f5   :  { %v1426_v29 = vadd.f32 %v1424_v55, %v1256_v28 }
0x17f7   :  { %v1431_v20 = vadd.f32 %v1429_v25, %v1426_v29 }
0x17f9   :  { %1433 = vst.msk [vmem:[%s2123_s2] sm:$0x3] %vm1432_vm1, %v1431_v20 }

</bundles_post_ra>
